<compile_context>
chip_gen: v7x
topology: tpu7x:2x2x1
jax: 0.10.0
libtpu: 0.0.40
codegen_flags: <defaults>
</compile_context>

<pallas_src>
import functools

import jax
import jax.numpy as jnp
from jax import lax
from jax.experimental import pallas as pl
from jax.experimental.pallas import tpu as pltpu


# ----------------------------------------------------------------------------
# Pallas kernel (one batch block of Bb rows per grid step)
# ----------------------------------------------------------------------------
def _det_cls_kernel(len_smem,                                   # (B_pad,) int32 in SMEM
                    x_ref, lenv_ref,
                    wemb_ref, wrest_ref, bcc_ref, gamma_ref, beta_ref,
                    wih_f_ref, bih_f_ref, whh_f_ref, bhn_f_ref,  # fwd GRU (fused gates)
                    wih_b_ref, bih_b_ref, bhn_b_ref,             # bwd GRU (fused gates)
                    w1f_ref, w1b_ref, b1_ref, w2_ref, b2_ref, w3_ref, b3_ref,
                    out_ref,
                    gi_scr, feat_scr,
                    *, S, Bb, H, F, pad_label, cc_label, ln_eps, unroll):
    f32 = jnp.float32
    blk = pl.program_id(0)

    x = x_ref[...].reshape(S * Bb, x_ref.shape[-1])          # (S*Bb, D) time-major rows
    labels = x[:, 0:1].astype(jnp.int32)                     # (S*Bb, 1)
    x_rest = x[:, 1:]                                        # (S*Bb, 5+C)

    pad_mask = (labels != pad_label).astype(f32)
    cc_mask = (labels == cc_label).astype(f32)

    # --- fused embedding lookup + counts projection + concat (two block
    #     matmuls, no lane-axis concatenate) ---
    num_labels = wemb_ref.shape[0]
    lab_iota = lax.broadcasted_iota(jnp.int32, (1, num_labels), 1)
    onehot = (labels == lab_iota).astype(wemb_ref.dtype)     # (S*Bb, L)
    col_iota = lax.broadcasted_iota(jnp.int32, (1, x_rest.shape[-1]), 1)
    gate = jnp.where(col_iota < 5, 1.0, cc_mask)             # counts cols gated by cc_mask
    feat = (jnp.dot(onehot, wemb_ref[...], preferred_element_type=f32)
            + jnp.dot((x_rest * gate).astype(wrest_ref.dtype), wrest_ref[...],
                      preferred_element_type=f32)
            + cc_mask * bcc_ref[...])
    feat = feat * pad_mask                                   # (S*Bb, F)

    # --- LayerNorm over the feature dim ---
    mu = jnp.mean(feat, axis=-1, keepdims=True)
    var = jnp.mean((feat - mu) ** 2, axis=-1, keepdims=True)
    feat = (feat - mu) * lax.rsqrt(var + ln_eps) * gamma_ref[...] + beta_ref[...]

    # --- feat scratch (S, Bb, F): written once, read by the last-row gather ---
    feat_scr[...] = feat.reshape(S, Bb, F)

    # --- single fused input projection for all rows (one matmul, one scratch;
    #     biases [b_ir+b_hr | b_iz+b_hz | b_in] folded in) ---
    gi_scr[...] = (jnp.dot(feat.astype(wih_f_ref.dtype), wih_f_ref[...],
                           preferred_element_type=f32)
                   + bih_f_ref[...]).reshape(S, Bb, 3 * H)

    lengths = lenv_ref[...]                                  # (Bb, 1) int32

    # --- backward direction at t = length-1: SMEM-indexed gather of the last
    #     valid row, then one GRU step from h0 = 0 (z*h term vanishes) ---
    rows = []
    for b in range(Bb):
        t_last = jnp.maximum(len_smem[blk * Bb + b] - 1, 0)
        rows.append(feat_scr[t_last][b:b + 1, :])            # (1, F)
    x_last = jnp.concatenate(rows, axis=0)                   # (Bb, F)
    gib = (jnp.dot(x_last.astype(wih_b_ref.dtype), wih_b_ref[...],
                   preferred_element_type=f32) + bih_b_ref[...])
    r_b = jax.nn.sigmoid(gib[:, 0:H])
    z_b = jax.nn.sigmoid(gib[:, H:2 * H])
    n_b = jnp.tanh(gib[:, 2 * H:3 * H] + r_b * bhn_b_ref[...])
    h_bwd = (1.0 - z_b) * n_b

    # --- forward recurrence: one (Bb,H)@(H,3H) matmul per step, masked by
    #     validity so packed-sequence semantics are preserved ---
    whh = whh_f_ref[...]                                     # (H, 3H)
    bhn = bhn_f_ref[...]                                     # (1, H)

    def body(t, h):
        gi = gi_scr[t]                                       # (Bb, 3H) aligned read
        gh = jnp.dot(h, whh, preferred_element_type=f32)     # (Bb, 3H)
        r = jax.nn.sigmoid(gi[:, 0:H] + gh[:, 0:H])
        z = jax.nn.sigmoid(gi[:, H:2 * H] + gh[:, H:2 * H])
        n = jnp.tanh(gi[:, 2 * H:3 * H] + r * (gh[:, 2 * H:3 * H] + bhn))
        h_new = (1.0 - z) * n + z * h
        return jnp.where(t < lengths, h_new, h)

    h_fwd = lax.fori_loop(0, S, body, jnp.zeros((Bb, H), f32), unroll=unroll)

    # --- FC head; w1 pre-split so [h_fwd | h_bwd] is never concatenated ---
    # TODO(synk): nn.Dropout layers are implemented as identity (inference mode).
    h1 = jnp.maximum(jnp.dot(h_fwd, w1f_ref[...], preferred_element_type=f32)
                     + jnp.dot(h_bwd, w1b_ref[...], preferred_element_type=f32)
                     + b1_ref[...], 0.0)
    h2 = jnp.maximum(jnp.dot(h1, w2_ref[...], preferred_element_type=f32) + b2_ref[...], 0.0)
    logit = jnp.dot(h2, w3_ref[...], preferred_element_type=f32) + b3_ref[...]
    out_ref[...] = jax.nn.sigmoid(logit)


# ----------------------------------------------------------------------------
# Wrapper: assembles fused weights, pads batch, builds the batch-block grid
# ----------------------------------------------------------------------------
def detection_classification_forward(X, lengths, params, *, pad_label, cc_label,
                                     hidden_dim=16, batch_block=8,
                                     weights_dtype=jnp.float32):
    (emb, w_cc, b_cc, gamma, beta,
     w_ih_f, w_hh_f, b_ih_f, b_hh_f,
     w_ih_b, w_hh_b, b_ih_b, b_hh_b,
     w1, b1, w2, b2, w3, b3) = params

    B, S, D = X.shape
    H = hidden_dim
    L, E = emb.shape
    C, cc_dim = w_cc.shape
    F = E + 5 + cc_dim
    assert batch_block % 8 == 0

    # Block weights so [onehot | bbox,conf | counts] -> [emb | bbox,conf | cc_proj]
    w_emb_block = jnp.zeros((L, F), jnp.float32).at[:, :E].set(emb)
    w_rest_block = (jnp.zeros((5 + C, F), jnp.float32)
                    .at[:5, E:E + 5].set(jnp.eye(5, dtype=jnp.float32))
                    .at[5:, E + 5:].set(w_cc))
    b_cc_full = jnp.zeros((1, F), jnp.float32).at[:, E + 5:].set(b_cc)

    # Fused-gate GRU weights (columns in gate order [r | z | n]).
    def fuse_bias(b_ih, b_hh):          # (1, 3H): [b_ir+b_hr | b_iz+b_hz | b_in]
        return jnp.concatenate([b_ih[:, :2 * H] + b_hh[:, :2 * H], b_ih[:, 2 * H:]], axis=1)

    wih_f, whh_f = w_ih_f, w_hh_f                      # (F,3H), (H,3H)
    bih_f, bhn_f = fuse_bias(b_ih_f, b_hh_f), b_hh_f[:, 2 * H:]
    wih_b = w_ih_b
    bih_b, bhn_b = fuse_bias(b_ih_b, b_hh_b), b_hh_b[:, 2 * H:]
    # Backward state read at t=length-1 is one step from h0=0 -> w_hh_b unused.
    del w_hh_b

    w1f, w1b = w1[:H, :], w1[H:, :]

    # Batch padding to a sublane-friendly block (padded rows: PAD labels, length 1).
    lengths = jnp.clip(lengths.astype(jnp.int32).reshape(B), 1, S)
    Bb = batch_block
    B_pad = ((B + Bb - 1) // Bb) * Bb
    X = X.astype(jnp.float32)
    if B_pad != B:
        x_fill = jnp.zeros((B_pad - B, S, D), jnp.float32).at[:, :, 0].set(float(pad_label))
        X = jnp.concatenate([X, x_fill], axis=0)
        lengths = jnp.concatenate([lengths, jnp.ones((B_pad - B,), jnp.int32)], axis=0)

    X3 = jnp.transpose(X, (1, 0, 2))                   # (S, B_pad, D) time-major
    len_smem = lengths                                 # (B_pad,)  -> SMEM (scalar prefetch)
    len_vec = lengths.reshape(B_pad, 1)                # (B_pad,1) -> VMEM (loop mask)

    wd = weights_dtype                                 # bf16 optional on v6e/v7x
    weights = (w_emb_block.astype(wd), w_rest_block.astype(wd), b_cc_full, gamma, beta,
               wih_f.astype(wd), bih_f, whh_f, bhn_f,
               wih_b.astype(wd), bih_b, bhn_b,
               w1f, w1b, b1, w2, b2, w3, b3)

    unroll = True if S <= 16 else 8                    # gate full unroll to small S

    kern = functools.partial(_det_cls_kernel, S=S, Bb=Bb, H=H, F=F,
                             pad_label=pad_label, cc_label=cc_label,
                             ln_eps=1e-5, unroll=unroll)

    def full2d(arr):
        return pl.BlockSpec(arr.shape, lambda i, lens: (0, 0))

    grid_spec = pltpu.PrefetchScalarGridSpec(
        num_scalar_prefetch=1,
        grid=(B_pad // Bb,),
        in_specs=[pl.BlockSpec((S, Bb, D), lambda i, lens: (0, i, 0)),
                  pl.BlockSpec((Bb, 1), lambda i, lens: (i, 0))]
                 + [full2d(w) for w in weights],
        out_specs=pl.BlockSpec((Bb, 1), lambda i, lens: (i, 0)),
        scratch_shapes=[pltpu.VMEM((S, Bb, 3 * H), jnp.float32),
                        pltpu.VMEM((S, Bb, F), jnp.float32)],
    )

    out = pl.pallas_call(
        kern,
        out_shape=jax.ShapeDtypeStruct((B_pad, 1), jnp.float32),
        grid_spec=grid_spec,
        compiler_params=pltpu.CompilerParams(
            dimension_semantics=("parallel",),
            vmem_limit_bytes=32 * 1024 * 1024),
    )(len_smem, X3, len_vec, *weights)
    return out[:B, 0]                                  # (B,) probabilities


# ----------------------------------------------------------------------------
# Deterministic parameter initialization (mirrors _init_weights shapes/rules)
# ----------------------------------------------------------------------------
def _xavier_uniform(key, out_dim, in_dim):
    bound = (6.0 / (in_dim + out_dim)) ** 0.5
    w = jax.random.uniform(key, (out_dim, in_dim), jnp.float32, -bound, bound)
    return w.T                                         # store as (in, out)


def _orthogonal_t(key, rows, cols):
    w = jax.nn.initializers.orthogonal()(key, (rows, cols), jnp.float32)
    return w.T                                         # (cols, rows)


def init_params(key, *, num_classes, num_labels, embedding_dim=4, hidden_dim=16,
                class_counts_dim=8, fc_hidden_dim=(64, 32)):
    F = embedding_dim + 4 + 1 + class_counts_dim
    ks = jax.random.split(key, 9)
    emb = 0.01 * jax.random.normal(ks[0], (num_labels, embedding_dim), jnp.float32)
    w_cc = _xavier_uniform(ks[1], class_counts_dim, num_classes)      # (C, cc_dim)
    b_cc = jnp.zeros((1, class_counts_dim), jnp.float32)
    gamma = jnp.ones((1, F), jnp.float32)
    beta = jnp.zeros((1, F), jnp.float32)
    # GRU (bidirectional, 1 layer); gate order [r, z, n]
    w_ih_f = _xavier_uniform(ks[2], 3 * hidden_dim, F)                # (F, 3H)
    w_hh_f = _orthogonal_t(ks[3], 3 * hidden_dim, hidden_dim)         # (H, 3H)
    b_ih_f = jnp.zeros((1, 3 * hidden_dim), jnp.float32)
    b_hh_f = jnp.zeros((1, 3 * hidden_dim), jnp.float32)
    w_ih_b = _xavier_uniform(ks[4], 3 * hidden_dim, F)
    w_hh_b = _orthogonal_t(ks[5], 3 * hidden_dim, hidden_dim)
    b_ih_b = jnp.zeros((1, 3 * hidden_dim), jnp.float32)
    b_hh_b = jnp.zeros((1, 3 * hidden_dim), jnp.float32)
    # FC head
    w1 = _xavier_uniform(ks[6], fc_hidden_dim[0], 2 * hidden_dim)     # (2H, 64)
    b1 = jnp.zeros((1, fc_hidden_dim[0]), jnp.float32)
    w2 = _xavier_uniform(ks[7], fc_hidden_dim[1], fc_hidden_dim[0])   # (64, 32)
    b2 = jnp.zeros((1, fc_hidden_dim[1]), jnp.float32)
    w3 = _xavier_uniform(ks[8], 1, fc_hidden_dim[1])                  # (32, 1)
    b3 = jnp.zeros((1, 1), jnp.float32)
    return [emb, w_cc, b_cc, gamma, beta,
            w_ih_f, w_hh_f, b_ih_f, b_hh_f,
            w_ih_b, w_hh_b, b_ih_b, b_hh_b,
            w1, b1, w2, b2, w3, b3]


# ----------------------------------------------------------------------------
# Example run
# ----------------------------------------------------------------------------
if __name__ == "__main__":
    B, S = 2, 8
    NUM_CLASSES = 7                   # data_dim = 6 + num_classes = 13
    NUM_LABELS = 10
    PAD_LABEL = 9
    CLASS_COUNTS_LABEL = 8

    key = jax.random.PRNGKey(0)
    k_lab, k_bbox, k_conf, k_cnt, k_par = jax.random.split(key, 5)

    lengths = jnp.array([8, 5], dtype=jnp.int32)
    labels = jax.random.randint(k_lab, (B, S), 0, NUM_LABELS - 2)     # real labels 0..7
    labels = labels.at[:, 0].set(CLASS_COUNTS_LABEL)                  # counts token at t=0
    t_idx = jnp.arange(S)[None, :]
    labels = jnp.where(t_idx < lengths[:, None], labels, PAD_LABEL)   # pad tail

    bbox = jax.random.uniform(k_bbox, (B, S, 4), jnp.float32)
    conf = jax.random.uniform(k_conf, (B, S, 1), jnp.float32)
    counts = jax.random.uniform(k_cnt, (B, S, NUM_CLASSES), jnp.float32)
    X = jnp.concatenate(
        [labels[..., None].astype(jnp.float32), bbox, conf, counts], axis=-1
    )  # (B, S, 13)

    params = init_params(k_par, num_classes=NUM_CLASSES, num_labels=NUM_LABELS)

    probs = detection_classification_forward(
        X, lengths, params, pad_label=PAD_LABEL, cc_label=CLASS_COUNTS_LABEL
    )
    jax.block_until_ready(probs)
    assert probs.shape == (B,)
    print("KERNEL_OK")
</pallas_src>

<mosaic_0001>
module attributes {stable_mosaic.version = 11 : i64} {
  func.func @_det_cls_kernel(%arg0: i32, %arg1: memref<8xi32, #tpu.memory_space<smem>>, %arg2: memref<8x8x13xf32, #tpu.memory_space<vmem>>, %arg3: memref<8x1xi32, #tpu.memory_space<vmem>>, %arg4: memref<10x17xf32, #tpu.memory_space<vmem>>, %arg5: memref<12x17xf32, #tpu.memory_space<vmem>>, %arg6: memref<1x17xf32, #tpu.memory_space<vmem>>, %arg7: memref<1x17xf32, #tpu.memory_space<vmem>>, %arg8: memref<1x17xf32, #tpu.memory_space<vmem>>, %arg9: memref<17x48xf32, #tpu.memory_space<vmem>>, %arg10: memref<1x48xf32, #tpu.memory_space<vmem>>, %arg11: memref<16x48xf32, #tpu.memory_space<vmem>>, %arg12: memref<1x16xf32, #tpu.memory_space<vmem>>, %arg13: memref<17x48xf32, #tpu.memory_space<vmem>>, %arg14: memref<1x48xf32, #tpu.memory_space<vmem>>, %arg15: memref<1x16xf32, #tpu.memory_space<vmem>>, %arg16: memref<16x64xf32, #tpu.memory_space<vmem>>, %arg17: memref<16x64xf32, #tpu.memory_space<vmem>>, %arg18: memref<1x64xf32, #tpu.memory_space<vmem>>, %arg19: memref<64x32xf32, #tpu.memory_space<vmem>>, %arg20: memref<1x32xf32, #tpu.memory_space<vmem>>, %arg21: memref<32x1xf32, #tpu.memory_space<vmem>>, %arg22: memref<1x1xf32, #tpu.memory_space<vmem>>, %arg23: memref<8x1xf32, #tpu.memory_space<vmem>>, %arg24: memref<8x8x48xf32, #tpu.memory_space<vmem>>, %arg25: memref<8x8x17xf32, #tpu.memory_space<vmem>>) attributes {dimension_semantics = [#tpu.dimension_semantics<parallel>], iteration_bounds = array<i64: 1>, scalar_prefetch = 1 : i64, scratch_operands = 2 : i64, tpu.core_type = #tpu.core_type<tc>, window_params = [{transform_indices = @transform_0, window_bounds = array<i64: 8, 8, 13>}, {transform_indices = @transform_1, window_bounds = array<i64: 8, 1>}, {pipeline_mode = #tpu.pipeline_mode<synchronous>, transform_indices = @transform_2, window_bounds = array<i64: 10, 17>}, {pipeline_mode = #tpu.pipeline_mode<synchronous>, transform_indices = @transform_3, window_bounds = array<i64: 12, 17>}, {pipeline_mode = #tpu.pipeline_mode<synchronous>, transform_indices = @transform_4, window_bounds = array<i64: 1, 17>}, {pipeline_mode = #tpu.pipeline_mode<synchronous>, transform_indices = @transform_5, window_bounds = array<i64: 1, 17>}, {pipeline_mode = #tpu.pipeline_mode<synchronous>, transform_indices = @transform_6, window_bounds = array<i64: 1, 17>}, {pipeline_mode = #tpu.pipeline_mode<synchronous>, transform_indices = @transform_7, window_bounds = array<i64: 17, 48>}, {pipeline_mode = #tpu.pipeline_mode<synchronous>, transform_indices = @transform_8, window_bounds = array<i64: 1, 48>}, {pipeline_mode = #tpu.pipeline_mode<synchronous>, transform_indices = @transform_9, window_bounds = array<i64: 16, 48>}, {pipeline_mode = #tpu.pipeline_mode<synchronous>, transform_indices = @transform_10, window_bounds = array<i64: 1, 16>}, {pipeline_mode = #tpu.pipeline_mode<synchronous>, transform_indices = @transform_11, window_bounds = array<i64: 17, 48>}, {pipeline_mode = #tpu.pipeline_mode<synchronous>, transform_indices = @transform_12, window_bounds = array<i64: 1, 48>}, {pipeline_mode = #tpu.pipeline_mode<synchronous>, transform_indices = @transform_13, window_bounds = array<i64: 1, 16>}, {pipeline_mode = #tpu.pipeline_mode<synchronous>, transform_indices = @transform_14, window_bounds = array<i64: 16, 64>}, {pipeline_mode = #tpu.pipeline_mode<synchronous>, transform_indices = @transform_15, window_bounds = array<i64: 16, 64>}, {pipeline_mode = #tpu.pipeline_mode<synchronous>, transform_indices = @transform_16, window_bounds = array<i64: 1, 64>}, {pipeline_mode = #tpu.pipeline_mode<synchronous>, transform_indices = @transform_17, window_bounds = array<i64: 64, 32>}, {pipeline_mode = #tpu.pipeline_mode<synchronous>, transform_indices = @transform_18, window_bounds = array<i64: 1, 32>}, {pipeline_mode = #tpu.pipeline_mode<synchronous>, transform_indices = @transform_19, window_bounds = array<i64: 32, 1>}, {pipeline_mode = #tpu.pipeline_mode<synchronous>, transform_indices = @transform_20, window_bounds = array<i64: 1, 1>}, {transform_indices = @transform_21, window_bounds = array<i64: 8, 1>}]} {
    %c0 = arith.constant 0 : index
    %c0_0 = arith.constant 0 : index
    %c0_1 = arith.constant 0 : index
    %0 = vector.load %arg2[%c0, %c0_0, %c0_1] : memref<8x8x13xf32, #tpu.memory_space<vmem>>, vector<8x8x13xf32>
    %1 = vector.shape_cast %0 : vector<8x8x13xf32> to vector<64x13xf32>
    %2 = vector.extract_strided_slice %1 {offsets = [0, 0], sizes = [64, 1], strides = [1, 1]} : vector<64x13xf32> to vector<64x1xf32>
    %3 = arith.fptosi %2 : vector<64x1xf32> to vector<64x1xi32>
    %4 = vector.extract_strided_slice %1 {offsets = [0, 1], sizes = [64, 12], strides = [1, 1]} : vector<64x13xf32> to vector<64x12xf32>
    %c9_i32 = arith.constant 9 : i32
    %5 = vector.broadcast %c9_i32 : i32 to vector<64x1xi32>
    %6 = arith.cmpi ne, %3, %5 : vector<64x1xi32>
    %7 = arith.extui %6 : vector<64x1xi1> to vector<64x1xi32>
    %8 = arith.sitofp %7 : vector<64x1xi32> to vector<64x1xf32>
    %c8_i32 = arith.constant 8 : i32
    %9 = vector.broadcast %c8_i32 : i32 to vector<64x1xi32>
    %10 = arith.cmpi eq, %3, %9 : vector<64x1xi32>
    %11 = arith.extui %10 : vector<64x1xi1> to vector<64x1xi32>
    %12 = arith.sitofp %11 : vector<64x1xi32> to vector<64x1xf32>
    %13 = tpu.iota {dimensions = array<i32: 1>} : vector<1x10xi32>
    %14 = vector.broadcast %3 : vector<64x1xi32> to vector<64x10xi32>
    %15 = vector.broadcast %13 : vector<1x10xi32> to vector<64x10xi32>
    %16 = arith.cmpi eq, %14, %15 : vector<64x10xi32>
    %17 = arith.extui %16 : vector<64x10xi1> to vector<64x10xi32>
    %18 = arith.sitofp %17 : vector<64x10xi32> to vector<64x10xf32>
    %19 = tpu.iota {dimensions = array<i32: 1>} : vector<1x12xi32>
    %c5_i32 = arith.constant 5 : i32
    %20 = vector.broadcast %c5_i32 : i32 to vector<1x12xi32>
    %21 = arith.cmpi slt, %19, %20 : vector<1x12xi32>
    %cst = arith.constant 1.000000e+00 : f32
    %22 = vector.shape_cast %21 : vector<1x12xi1> to vector<1x12xi1>
    %23 = vector.broadcast %22 : vector<1x12xi1> to vector<64x12xi1>
    %24 = vector.broadcast %cst : f32 to vector<64x12xf32>
    %25 = vector.shape_cast %12 : vector<64x1xf32> to vector<64x1xf32>
    %26 = vector.broadcast %25 : vector<64x1xf32> to vector<64x12xf32>
    %27 = arith.select %23, %24, %26 : vector<64x12xi1>, vector<64x12xf32>
    %c0_2 = arith.constant 0 : index
    %c0_3 = arith.constant 0 : index
    %28 = vector.load %arg4[%c0_2, %c0_3] : memref<10x17xf32, #tpu.memory_space<vmem>>, vector<10x17xf32>
    %cst_4 = arith.constant dense<0.000000e+00> : vector<64x17xf32>
    %29 = tpu.matmul %18, %28, %cst_4 {dimension_numbers = #tpu.dot_dimension_numbers<[1], [0], [0], [1], [0, 0, 1, 1], [], []>} : vector<64x10xf32>, vector<10x17xf32>, vector<64x17xf32> -> vector<64x17xf32>
    %30 = arith.mulf %4, %27 : vector<64x12xf32>
    %c0_5 = arith.constant 0 : index
    %c0_6 = arith.constant 0 : index
    %31 = vector.load %arg5[%c0_5, %c0_6] : memref<12x17xf32, #tpu.memory_space<vmem>>, vector<12x17xf32>
    %cst_7 = arith.constant dense<0.000000e+00> : vector<64x17xf32>
    %32 = tpu.matmul %30, %31, %cst_7 {dimension_numbers = #tpu.dot_dimension_numbers<[1], [0], [0], [1], [0, 0, 1, 1], [], []>} : vector<64x12xf32>, vector<12x17xf32>, vector<64x17xf32> -> vector<64x17xf32>
    %33 = arith.addf %29, %32 : vector<64x17xf32>
    %c0_8 = arith.constant 0 : index
    %c0_9 = arith.constant 0 : index
    %34 = vector.load %arg6[%c0_8, %c0_9] : memref<1x17xf32, #tpu.memory_space<vmem>>, vector<1x17xf32>
    %35 = vector.broadcast %12 : vector<64x1xf32> to vector<64x17xf32>
    %36 = vector.broadcast %34 : vector<1x17xf32> to vector<64x17xf32>
    %37 = arith.mulf %35, %36 : vector<64x17xf32>
    %38 = arith.addf %33, %37 : vector<64x17xf32>
    %39 = vector.broadcast %8 : vector<64x1xf32> to vector<64x17xf32>
    %40 = arith.mulf %38, %39 : vector<64x17xf32>
    %cst_10 = arith.constant dense<0.000000e+00> : vector<64xf32>
    %41 = vector.multi_reduction <add>, %40, %cst_10 [1] : vector<64x17xf32> to vector<64xf32>
    %42 = vector.shape_cast %41 : vector<64xf32> to vector<64x1xf32>
    %cst_11 = arith.constant 1.700000e+01 : f32
    %43 = vector.broadcast %cst_11 : f32 to vector<64x1xf32>
    %44 = arith.divf %42, %43 : vector<64x1xf32>
    %45 = vector.broadcast %44 : vector<64x1xf32> to vector<64x17xf32>
    %46 = arith.subf %40, %45 : vector<64x17xf32>
    %47 = arith.mulf %46, %46 : vector<64x17xf32>
    %cst_12 = arith.constant dense<0.000000e+00> : vector<64xf32>
    %48 = vector.multi_reduction <add>, %47, %cst_12 [1] : vector<64x17xf32> to vector<64xf32>
    %49 = vector.shape_cast %48 : vector<64xf32> to vector<64x1xf32>
    %cst_13 = arith.constant 1.700000e+01 : f32
    %50 = vector.broadcast %cst_13 : f32 to vector<64x1xf32>
    %51 = arith.divf %49, %50 : vector<64x1xf32>
    %52 = vector.broadcast %44 : vector<64x1xf32> to vector<64x17xf32>
    %53 = arith.subf %40, %52 : vector<64x17xf32>
    %cst_14 = arith.constant 9.99999974E-6 : f32
    %54 = vector.broadcast %cst_14 : f32 to vector<64x1xf32>
    %55 = arith.addf %51, %54 : vector<64x1xf32>
    %56 = math.rsqrt %55 : vector<64x1xf32>
    %57 = vector.broadcast %56 : vector<64x1xf32> to vector<64x17xf32>
    %58 = arith.mulf %53, %57 : vector<64x17xf32>
    %c0_15 = arith.constant 0 : index
    %c0_16 = arith.constant 0 : index
    %59 = vector.load %arg7[%c0_15, %c0_16] : memref<1x17xf32, #tpu.memory_space<vmem>>, vector<1x17xf32>
    %60 = vector.broadcast %59 : vector<1x17xf32> to vector<64x17xf32>
    %61 = arith.mulf %58, %60 : vector<64x17xf32>
    %c0_17 = arith.constant 0 : index
    %c0_18 = arith.constant 0 : index
    %62 = vector.load %arg8[%c0_17, %c0_18] : memref<1x17xf32, #tpu.memory_space<vmem>>, vector<1x17xf32>
    %63 = vector.broadcast %62 : vector<1x17xf32> to vector<64x17xf32>
    %64 = arith.addf %61, %63 : vector<64x17xf32>
    %65 = vector.shape_cast %64 : vector<64x17xf32> to vector<8x8x17xf32>
    %c0_19 = arith.constant 0 : index
    %c0_20 = arith.constant 0 : index
    %c0_21 = arith.constant 0 : index
    %66 = vector.load %arg25[%c0_19, %c0_20, %c0_21] : memref<8x8x17xf32, #tpu.memory_space<vmem>>, vector<8x8x17xf32>
    tpu.vector_store %arg25[%c0_19, %c0_20, %c0_21], %65 {strides = array<i32>} : memref<8x8x17xf32, #tpu.memory_space<vmem>>, vector<8x8x17xf32>,
    %c0_22 = arith.constant 0 : index
    %c0_23 = arith.constant 0 : index
    %67 = vector.load %arg9[%c0_22, %c0_23] : memref<17x48xf32, #tpu.memory_space<vmem>>, vector<17x48xf32>
    %cst_24 = arith.constant dense<0.000000e+00> : vector<64x48xf32>
    %68 = tpu.matmul %64, %67, %cst_24 {dimension_numbers = #tpu.dot_dimension_numbers<[1], [0], [0], [1], [0, 0, 1, 1], [], []>} : vector<64x17xf32>, vector<17x48xf32>, vector<64x48xf32> -> vector<64x48xf32>
    %c0_25 = arith.constant 0 : index
    %c0_26 = arith.constant 0 : index
    %69 = vector.load %arg10[%c0_25, %c0_26] : memref<1x48xf32, #tpu.memory_space<vmem>>, vector<1x48xf32>
    %70 = vector.broadcast %69 : vector<1x48xf32> to vector<64x48xf32>
    %71 = arith.addf %68, %70 : vector<64x48xf32>
    %72 = vector.shape_cast %71 : vector<64x48xf32> to vector<8x8x48xf32>
    %c0_27 = arith.constant 0 : index
    %c0_28 = arith.constant 0 : index
    %c0_29 = arith.constant 0 : index
    %73 = vector.load %arg24[%c0_27, %c0_28, %c0_29] : memref<8x8x48xf32, #tpu.memory_space<vmem>>, vector<8x8x48xf32>
    tpu.vector_store %arg24[%c0_27, %c0_28, %c0_29], %72 {strides = array<i32>} : memref<8x8x48xf32, #tpu.memory_space<vmem>>, vector<8x8x48xf32>,
    %c0_30 = arith.constant 0 : index
    %c0_31 = arith.constant 0 : index
    %74 = vector.load %arg3[%c0_30, %c0_31] : memref<8x1xi32, #tpu.memory_space<vmem>>, vector<8x1xi32>
    %c8_i32_32 = arith.constant 8 : i32
    %75 = arith.muli %arg0, %c8_i32_32 : i32
    %c0_i32 = arith.constant 0 : i32
    %76 = arith.addi %75, %c0_i32 : i32
    %77 = arith.index_cast %76 : i32 to index
    %78 = memref.load %arg1[%77] : memref<8xi32, #tpu.memory_space<smem>>
    %c1_i32 = arith.constant 1 : i32
    %79 = arith.subi %78, %c1_i32 : i32
    %c0_i32_33 = arith.constant 0 : i32
    %80 = arith.maxsi %79, %c0_i32_33 : i32
    %81 = arith.index_cast %80 : i32 to index
    %c0_34 = arith.constant 0 : index
    %c0_35 = arith.constant 0 : index
    %82 = vector.load %arg25[%81, %c0_34, %c0_35] : memref<8x8x17xf32, #tpu.memory_space<vmem>>, vector<1x8x17xf32>
    %83 = vector.shape_cast %82 : vector<1x8x17xf32> to vector<8x17xf32>
    %84 = vector.extract_strided_slice %83 {offsets = [0, 0], sizes = [1, 17], strides = [1, 1]} : vector<8x17xf32> to vector<1x17xf32>
    %c8_i32_36 = arith.constant 8 : i32
    %85 = arith.muli %arg0, %c8_i32_36 : i32
    %c1_i32_37 = arith.constant 1 : i32
    %86 = arith.addi %85, %c1_i32_37 : i32
    %87 = arith.index_cast %86 : i32 to index
    %88 = memref.load %arg1[%87] : memref<8xi32, #tpu.memory_space<smem>>
    %c1_i32_38 = arith.constant 1 : i32
    %89 = arith.subi %88, %c1_i32_38 : i32
    %c0_i32_39 = arith.constant 0 : i32
    %90 = arith.maxsi %89, %c0_i32_39 : i32
    %91 = arith.index_cast %90 : i32 to index
    %c0_40 = arith.constant 0 : index
    %c0_41 = arith.constant 0 : index
    %92 = vector.load %arg25[%91, %c0_40, %c0_41] : memref<8x8x17xf32, #tpu.memory_space<vmem>>, vector<1x8x17xf32>
    %93 = vector.shape_cast %92 : vector<1x8x17xf32> to vector<8x17xf32>
    %94 = vector.extract_strided_slice %93 {offsets = [1, 0], sizes = [1, 17], strides = [1, 1]} : vector<8x17xf32> to vector<1x17xf32>
    %c8_i32_42 = arith.constant 8 : i32
    %95 = arith.muli %arg0, %c8_i32_42 : i32
    %c2_i32 = arith.constant 2 : i32
    %96 = arith.addi %95, %c2_i32 : i32
    %97 = arith.index_cast %96 : i32 to index
    %98 = memref.load %arg1[%97] : memref<8xi32, #tpu.memory_space<smem>>
    %c1_i32_43 = arith.constant 1 : i32
    %99 = arith.subi %98, %c1_i32_43 : i32
    %c0_i32_44 = arith.constant 0 : i32
    %100 = arith.maxsi %99, %c0_i32_44 : i32
    %101 = arith.index_cast %100 : i32 to index
    %c0_45 = arith.constant 0 : index
    %c0_46 = arith.constant 0 : index
    %102 = vector.load %arg25[%101, %c0_45, %c0_46] : memref<8x8x17xf32, #tpu.memory_space<vmem>>, vector<1x8x17xf32>
    %103 = vector.shape_cast %102 : vector<1x8x17xf32> to vector<8x17xf32>
    %104 = vector.extract_strided_slice %103 {offsets = [2, 0], sizes = [1, 17], strides = [1, 1]} : vector<8x17xf32> to vector<1x17xf32>
    %c8_i32_47 = arith.constant 8 : i32
    %105 = arith.muli %arg0, %c8_i32_47 : i32
    %c3_i32 = arith.constant 3 : i32
    %106 = arith.addi %105, %c3_i32 : i32
    %107 = arith.index_cast %106 : i32 to index
    %108 = memref.load %arg1[%107] : memref<8xi32, #tpu.memory_space<smem>>
    %c1_i32_48 = arith.constant 1 : i32
    %109 = arith.subi %108, %c1_i32_48 : i32
    %c0_i32_49 = arith.constant 0 : i32
    %110 = arith.maxsi %109, %c0_i32_49 : i32
    %111 = arith.index_cast %110 : i32 to index
    %c0_50 = arith.constant 0 : index
    %c0_51 = arith.constant 0 : index
    %112 = vector.load %arg25[%111, %c0_50, %c0_51] : memref<8x8x17xf32, #tpu.memory_space<vmem>>, vector<1x8x17xf32>
    %113 = vector.shape_cast %112 : vector<1x8x17xf32> to vector<8x17xf32>
    %114 = vector.extract_strided_slice %113 {offsets = [3, 0], sizes = [1, 17], strides = [1, 1]} : vector<8x17xf32> to vector<1x17xf32>
    %c8_i32_52 = arith.constant 8 : i32
    %115 = arith.muli %arg0, %c8_i32_52 : i32
    %c4_i32 = arith.constant 4 : i32
    %116 = arith.addi %115, %c4_i32 : i32
    %117 = arith.index_cast %116 : i32 to index
    %118 = memref.load %arg1[%117] : memref<8xi32, #tpu.memory_space<smem>>
    %c1_i32_53 = arith.constant 1 : i32
    %119 = arith.subi %118, %c1_i32_53 : i32
    %c0_i32_54 = arith.constant 0 : i32
    %120 = arith.maxsi %119, %c0_i32_54 : i32
    %121 = arith.index_cast %120 : i32 to index
    %c0_55 = arith.constant 0 : index
    %c0_56 = arith.constant 0 : index
    %122 = vector.load %arg25[%121, %c0_55, %c0_56] : memref<8x8x17xf32, #tpu.memory_space<vmem>>, vector<1x8x17xf32>
    %123 = vector.shape_cast %122 : vector<1x8x17xf32> to vector<8x17xf32>
    %124 = vector.extract_strided_slice %123 {offsets = [4, 0], sizes = [1, 17], strides = [1, 1]} : vector<8x17xf32> to vector<1x17xf32>
    %c8_i32_57 = arith.constant 8 : i32
    %125 = arith.muli %arg0, %c8_i32_57 : i32
    %c5_i32_58 = arith.constant 5 : i32
    %126 = arith.addi %125, %c5_i32_58 : i32
    %127 = arith.index_cast %126 : i32 to index
    %128 = memref.load %arg1[%127] : memref<8xi32, #tpu.memory_space<smem>>
    %c1_i32_59 = arith.constant 1 : i32
    %129 = arith.subi %128, %c1_i32_59 : i32
    %c0_i32_60 = arith.constant 0 : i32
    %130 = arith.maxsi %129, %c0_i32_60 : i32
    %131 = arith.index_cast %130 : i32 to index
    %c0_61 = arith.constant 0 : index
    %c0_62 = arith.constant 0 : index
    %132 = vector.load %arg25[%131, %c0_61, %c0_62] : memref<8x8x17xf32, #tpu.memory_space<vmem>>, vector<1x8x17xf32>
    %133 = vector.shape_cast %132 : vector<1x8x17xf32> to vector<8x17xf32>
    %134 = vector.extract_strided_slice %133 {offsets = [5, 0], sizes = [1, 17], strides = [1, 1]} : vector<8x17xf32> to vector<1x17xf32>
    %c8_i32_63 = arith.constant 8 : i32
    %135 = arith.muli %arg0, %c8_i32_63 : i32
    %c6_i32 = arith.constant 6 : i32
    %136 = arith.addi %135, %c6_i32 : i32
    %137 = arith.index_cast %136 : i32 to index
    %138 = memref.load %arg1[%137] : memref<8xi32, #tpu.memory_space<smem>>
    %c1_i32_64 = arith.constant 1 : i32
    %139 = arith.subi %138, %c1_i32_64 : i32
    %c0_i32_65 = arith.constant 0 : i32
    %140 = arith.maxsi %139, %c0_i32_65 : i32
    %141 = arith.index_cast %140 : i32 to index
    %c0_66 = arith.constant 0 : index
    %c0_67 = arith.constant 0 : index
    %142 = vector.load %arg25[%141, %c0_66, %c0_67] : memref<8x8x17xf32, #tpu.memory_space<vmem>>, vector<1x8x17xf32>
    %143 = vector.shape_cast %142 : vector<1x8x17xf32> to vector<8x17xf32>
    %144 = vector.extract_strided_slice %143 {offsets = [6, 0], sizes = [1, 17], strides = [1, 1]} : vector<8x17xf32> to vector<1x17xf32>
    %c8_i32_68 = arith.constant 8 : i32
    %145 = arith.muli %arg0, %c8_i32_68 : i32
    %c7_i32 = arith.constant 7 : i32
    %146 = arith.addi %145, %c7_i32 : i32
    %147 = arith.index_cast %146 : i32 to index
    %148 = memref.load %arg1[%147] : memref<8xi32, #tpu.memory_space<smem>>
    %c1_i32_69 = arith.constant 1 : i32
    %149 = arith.subi %148, %c1_i32_69 : i32
    %c0_i32_70 = arith.constant 0 : i32
    %150 = arith.maxsi %149, %c0_i32_70 : i32
    %151 = arith.index_cast %150 : i32 to index
    %c0_71 = arith.constant 0 : index
    %c0_72 = arith.constant 0 : index
    %152 = vector.load %arg25[%151, %c0_71, %c0_72] : memref<8x8x17xf32, #tpu.memory_space<vmem>>, vector<1x8x17xf32>
    %153 = vector.shape_cast %152 : vector<1x8x17xf32> to vector<8x17xf32>
    %154 = vector.extract_strided_slice %153 {offsets = [7, 0], sizes = [1, 17], strides = [1, 1]} : vector<8x17xf32> to vector<1x17xf32>
    %155 = tpu.concatenate %84, %94, %104, %114, %124, %134, %144, %154 in 0 : vector<1x17xf32>, vector<1x17xf32>, vector<1x17xf32>, vector<1x17xf32>, vector<1x17xf32>, vector<1x17xf32>, vector<1x17xf32>, vector<1x17xf32> -> vector<8x17xf32>
    %c0_73 = arith.constant 0 : index
    %c0_74 = arith.constant 0 : index
    %156 = vector.load %arg13[%c0_73, %c0_74] : memref<17x48xf32, #tpu.memory_space<vmem>>, vector<17x48xf32>
    %cst_75 = arith.constant dense<0.000000e+00> : vector<8x48xf32>
    %157 = tpu.matmul %155, %156, %cst_75 {dimension_numbers = #tpu.dot_dimension_numbers<[1], [0], [0], [1], [0, 0, 1, 1], [], []>} : vector<8x17xf32>, vector<17x48xf32>, vector<8x48xf32> -> vector<8x48xf32>
    %c0_76 = arith.constant 0 : index
    %c0_77 = arith.constant 0 : index
    %158 = vector.load %arg14[%c0_76, %c0_77] : memref<1x48xf32, #tpu.memory_space<vmem>>, vector<1x48xf32>
    %159 = vector.broadcast %158 : vector<1x48xf32> to vector<8x48xf32>
    %160 = arith.addf %157, %159 : vector<8x48xf32>
    %161 = vector.extract_strided_slice %160 {offsets = [0, 0], sizes = [8, 16], strides = [1, 1]} : vector<8x48xf32> to vector<8x16xf32>
    %162 = arith.negf %161 : vector<8x16xf32>
    %163 = math.exp %162 : vector<8x16xf32>
    %cst_78 = arith.constant 1.000000e+00 : f32
    %164 = vector.broadcast %cst_78 : f32 to vector<8x16xf32>
    %165 = arith.addf %164, %163 : vector<8x16xf32>
    %166 = arith.divf %164, %165 : vector<8x16xf32>
    %167 = vector.extract_strided_slice %160 {offsets = [0, 16], sizes = [8, 16], strides = [1, 1]} : vector<8x48xf32> to vector<8x16xf32>
    %168 = arith.negf %167 : vector<8x16xf32>
    %169 = math.exp %168 : vector<8x16xf32>
    %cst_79 = arith.constant 1.000000e+00 : f32
    %170 = vector.broadcast %cst_79 : f32 to vector<8x16xf32>
    %171 = arith.addf %170, %169 : vector<8x16xf32>
    %172 = arith.divf %170, %171 : vector<8x16xf32>
    %173 = vector.extract_strided_slice %160 {offsets = [0, 32], sizes = [8, 16], strides = [1, 1]} : vector<8x48xf32> to vector<8x16xf32>
    %c0_80 = arith.constant 0 : index
    %c0_81 = arith.constant 0 : index
    %174 = vector.load %arg15[%c0_80, %c0_81] : memref<1x16xf32, #tpu.memory_space<vmem>>, vector<1x16xf32>
    %175 = vector.broadcast %174 : vector<1x16xf32> to vector<8x16xf32>
    %176 = arith.mulf %166, %175 : vector<8x16xf32>
    %177 = arith.addf %173, %176 : vector<8x16xf32>
    %178 = math.tanh %177 : vector<8x16xf32>
    %cst_82 = arith.constant 1.000000e+00 : f32
    %179 = vector.broadcast %cst_82 : f32 to vector<8x16xf32>
    %180 = arith.subf %179, %172 : vector<8x16xf32>
    %181 = arith.mulf %180, %178 : vector<8x16xf32>
    %c0_83 = arith.constant 0 : index
    %c0_84 = arith.constant 0 : index
    %182 = vector.load %arg11[%c0_83, %c0_84] : memref<16x48xf32, #tpu.memory_space<vmem>>, vector<16x48xf32>
    %c0_85 = arith.constant 0 : index
    %c0_86 = arith.constant 0 : index
    %183 = vector.load %arg12[%c0_85, %c0_86] : memref<1x16xf32, #tpu.memory_space<vmem>>, vector<1x16xf32>
    %cst_87 = arith.constant 0.000000e+00 : f32
    %184 = vector.broadcast %cst_87 : f32 to vector<8x16xf32>
    %c0_i32_88 = arith.constant 0 : i32
    %185 = arith.index_cast %c0_i32_88 : i32 to index
    %c0_89 = arith.constant 0 : index
    %c0_90 = arith.constant 0 : index
    %186 = vector.load %arg24[%185, %c0_89, %c0_90] : memref<8x8x48xf32, #tpu.memory_space<vmem>>, vector<1x8x48xf32>
    %187 = vector.shape_cast %186 : vector<1x8x48xf32> to vector<8x48xf32>
    %cst_91 = arith.constant dense<0.000000e+00> : vector<8x48xf32>
    %188 = tpu.matmul %184, %182, %cst_91 {dimension_numbers = #tpu.dot_dimension_numbers<[1], [0], [0], [1], [0, 0, 1, 1], [], []>} : vector<8x16xf32>, vector<16x48xf32>, vector<8x48xf32> -> vector<8x48xf32>
    %189 = vector.extract_strided_slice %187 {offsets = [0, 0], sizes = [8, 16], strides = [1, 1]} : vector<8x48xf32> to vector<8x16xf32>
    %190 = vector.extract_strided_slice %188 {offsets = [0, 0], sizes = [8, 16], strides = [1, 1]} : vector<8x48xf32> to vector<8x16xf32>
    %191 = arith.addf %189, %190 : vector<8x16xf32>
    %192 = arith.negf %191 : vector<8x16xf32>
    %193 = math.exp %192 : vector<8x16xf32>
    %cst_92 = arith.constant 1.000000e+00 : f32
    %194 = vector.broadcast %cst_92 : f32 to vector<8x16xf32>
    %195 = arith.addf %194, %193 : vector<8x16xf32>
    %196 = arith.divf %194, %195 : vector<8x16xf32>
    %197 = vector.extract_strided_slice %187 {offsets = [0, 16], sizes = [8, 16], strides = [1, 1]} : vector<8x48xf32> to vector<8x16xf32>
    %198 = vector.extract_strided_slice %188 {offsets = [0, 16], sizes = [8, 16], strides = [1, 1]} : vector<8x48xf32> to vector<8x16xf32>
    %199 = arith.addf %197, %198 : vector<8x16xf32>
    %200 = arith.negf %199 : vector<8x16xf32>
    %201 = math.exp %200 : vector<8x16xf32>
    %cst_93 = arith.constant 1.000000e+00 : f32
    %202 = vector.broadcast %cst_93 : f32 to vector<8x16xf32>
    %203 = arith.addf %202, %201 : vector<8x16xf32>
    %204 = arith.divf %202, %203 : vector<8x16xf32>
    %205 = vector.extract_strided_slice %187 {offsets = [0, 32], sizes = [8, 16], strides = [1, 1]} : vector<8x48xf32> to vector<8x16xf32>
    %206 = vector.extract_strided_slice %188 {offsets = [0, 32], sizes = [8, 16], strides = [1, 1]} : vector<8x48xf32> to vector<8x16xf32>
    %207 = vector.broadcast %183 : vector<1x16xf32> to vector<8x16xf32>
    %208 = arith.addf %206, %207 : vector<8x16xf32>
    %209 = arith.mulf %196, %208 : vector<8x16xf32>
    %210 = arith.addf %205, %209 : vector<8x16xf32>
    %211 = math.tanh %210 : vector<8x16xf32>
    %cst_94 = arith.constant 1.000000e+00 : f32
    %212 = vector.broadcast %cst_94 : f32 to vector<8x16xf32>
    %213 = arith.subf %212, %204 : vector<8x16xf32>
    %214 = arith.mulf %213, %211 : vector<8x16xf32>
    %215 = arith.mulf %204, %184 : vector<8x16xf32>
    %216 = arith.addf %214, %215 : vector<8x16xf32>
    %217 = vector.broadcast %c0_i32_88 : i32 to vector<8x1xi32>
    %218 = arith.cmpi slt, %217, %74 : vector<8x1xi32>
    %219 = vector.shape_cast %218 : vector<8x1xi1> to vector<8x1xi1>
    %220 = vector.broadcast %219 : vector<8x1xi1> to vector<8x16xi1>
    %221 = arith.select %220, %216, %184 : vector<8x16xi1>, vector<8x16xf32>
    %c1_i32_95 = arith.constant 1 : i32
    %222 = arith.index_cast %c1_i32_95 : i32 to index
    %c0_96 = arith.constant 0 : index
    %c0_97 = arith.constant 0 : index
    %223 = vector.load %arg24[%222, %c0_96, %c0_97] : memref<8x8x48xf32, #tpu.memory_space<vmem>>, vector<1x8x48xf32>
    %224 = vector.shape_cast %223 : vector<1x8x48xf32> to vector<8x48xf32>
    %cst_98 = arith.constant dense<0.000000e+00> : vector<8x48xf32>
    %225 = tpu.matmul %221, %182, %cst_98 {dimension_numbers = #tpu.dot_dimension_numbers<[1], [0], [0], [1], [0, 0, 1, 1], [], []>} : vector<8x16xf32>, vector<16x48xf32>, vector<8x48xf32> -> vector<8x48xf32>
    %226 = vector.extract_strided_slice %224 {offsets = [0, 0], sizes = [8, 16], strides = [1, 1]} : vector<8x48xf32> to vector<8x16xf32>
    %227 = vector.extract_strided_slice %225 {offsets = [0, 0], sizes = [8, 16], strides = [1, 1]} : vector<8x48xf32> to vector<8x16xf32>
    %228 = arith.addf %226, %227 : vector<8x16xf32>
    %229 = arith.negf %228 : vector<8x16xf32>
    %230 = math.exp %229 : vector<8x16xf32>
    %cst_99 = arith.constant 1.000000e+00 : f32
    %231 = vector.broadcast %cst_99 : f32 to vector<8x16xf32>
    %232 = arith.addf %231, %230 : vector<8x16xf32>
    %233 = arith.divf %231, %232 : vector<8x16xf32>
    %234 = vector.extract_strided_slice %224 {offsets = [0, 16], sizes = [8, 16], strides = [1, 1]} : vector<8x48xf32> to vector<8x16xf32>
    %235 = vector.extract_strided_slice %225 {offsets = [0, 16], sizes = [8, 16], strides = [1, 1]} : vector<8x48xf32> to vector<8x16xf32>
    %236 = arith.addf %234, %235 : vector<8x16xf32>
    %237 = arith.negf %236 : vector<8x16xf32>
    %238 = math.exp %237 : vector<8x16xf32>
    %cst_100 = arith.constant 1.000000e+00 : f32
    %239 = vector.broadcast %cst_100 : f32 to vector<8x16xf32>
    %240 = arith.addf %239, %238 : vector<8x16xf32>
    %241 = arith.divf %239, %240 : vector<8x16xf32>
    %242 = vector.extract_strided_slice %224 {offsets = [0, 32], sizes = [8, 16], strides = [1, 1]} : vector<8x48xf32> to vector<8x16xf32>
    %243 = vector.extract_strided_slice %225 {offsets = [0, 32], sizes = [8, 16], strides = [1, 1]} : vector<8x48xf32> to vector<8x16xf32>
    %244 = vector.broadcast %183 : vector<1x16xf32> to vector<8x16xf32>
    %245 = arith.addf %243, %244 : vector<8x16xf32>
    %246 = arith.mulf %233, %245 : vector<8x16xf32>
    %247 = arith.addf %242, %246 : vector<8x16xf32>
    %248 = math.tanh %247 : vector<8x16xf32>
    %cst_101 = arith.constant 1.000000e+00 : f32
    %249 = vector.broadcast %cst_101 : f32 to vector<8x16xf32>
    %250 = arith.subf %249, %241 : vector<8x16xf32>
    %251 = arith.mulf %250, %248 : vector<8x16xf32>
    %252 = arith.mulf %241, %221 : vector<8x16xf32>
    %253 = arith.addf %251, %252 : vector<8x16xf32>
    %254 = vector.broadcast %c1_i32_95 : i32 to vector<8x1xi32>
    %255 = arith.cmpi slt, %254, %74 : vector<8x1xi32>
    %256 = vector.shape_cast %255 : vector<8x1xi1> to vector<8x1xi1>
    %257 = vector.broadcast %256 : vector<8x1xi1> to vector<8x16xi1>
    %258 = arith.select %257, %253, %221 : vector<8x16xi1>, vector<8x16xf32>
    %c2_i32_102 = arith.constant 2 : i32
    %259 = arith.index_cast %c2_i32_102 : i32 to index
    %c0_103 = arith.constant 0 : index
    %c0_104 = arith.constant 0 : index
    %260 = vector.load %arg24[%259, %c0_103, %c0_104] : memref<8x8x48xf32, #tpu.memory_space<vmem>>, vector<1x8x48xf32>
    %261 = vector.shape_cast %260 : vector<1x8x48xf32> to vector<8x48xf32>
    %cst_105 = arith.constant dense<0.000000e+00> : vector<8x48xf32>
    %262 = tpu.matmul %258, %182, %cst_105 {dimension_numbers = #tpu.dot_dimension_numbers<[1], [0], [0], [1], [0, 0, 1, 1], [], []>} : vector<8x16xf32>, vector<16x48xf32>, vector<8x48xf32> -> vector<8x48xf32>
    %263 = vector.extract_strided_slice %261 {offsets = [0, 0], sizes = [8, 16], strides = [1, 1]} : vector<8x48xf32> to vector<8x16xf32>
    %264 = vector.extract_strided_slice %262 {offsets = [0, 0], sizes = [8, 16], strides = [1, 1]} : vector<8x48xf32> to vector<8x16xf32>
    %265 = arith.addf %263, %264 : vector<8x16xf32>
    %266 = arith.negf %265 : vector<8x16xf32>
    %267 = math.exp %266 : vector<8x16xf32>
    %cst_106 = arith.constant 1.000000e+00 : f32
    %268 = vector.broadcast %cst_106 : f32 to vector<8x16xf32>
    %269 = arith.addf %268, %267 : vector<8x16xf32>
    %270 = arith.divf %268, %269 : vector<8x16xf32>
    %271 = vector.extract_strided_slice %261 {offsets = [0, 16], sizes = [8, 16], strides = [1, 1]} : vector<8x48xf32> to vector<8x16xf32>
    %272 = vector.extract_strided_slice %262 {offsets = [0, 16], sizes = [8, 16], strides = [1, 1]} : vector<8x48xf32> to vector<8x16xf32>
    %273 = arith.addf %271, %272 : vector<8x16xf32>
    %274 = arith.negf %273 : vector<8x16xf32>
    %275 = math.exp %274 : vector<8x16xf32>
    %cst_107 = arith.constant 1.000000e+00 : f32
    %276 = vector.broadcast %cst_107 : f32 to vector<8x16xf32>
    %277 = arith.addf %276, %275 : vector<8x16xf32>
    %278 = arith.divf %276, %277 : vector<8x16xf32>
    %279 = vector.extract_strided_slice %261 {offsets = [0, 32], sizes = [8, 16], strides = [1, 1]} : vector<8x48xf32> to vector<8x16xf32>
    %280 = vector.extract_strided_slice %262 {offsets = [0, 32], sizes = [8, 16], strides = [1, 1]} : vector<8x48xf32> to vector<8x16xf32>
    %281 = vector.broadcast %183 : vector<1x16xf32> to vector<8x16xf32>
    %282 = arith.addf %280, %281 : vector<8x16xf32>
    %283 = arith.mulf %270, %282 : vector<8x16xf32>
    %284 = arith.addf %279, %283 : vector<8x16xf32>
    %285 = math.tanh %284 : vector<8x16xf32>
    %cst_108 = arith.constant 1.000000e+00 : f32
    %286 = vector.broadcast %cst_108 : f32 to vector<8x16xf32>
    %287 = arith.subf %286, %278 : vector<8x16xf32>
    %288 = arith.mulf %287, %285 : vector<8x16xf32>
    %289 = arith.mulf %278, %258 : vector<8x16xf32>
    %290 = arith.addf %288, %289 : vector<8x16xf32>
    %291 = vector.broadcast %c2_i32_102 : i32 to vector<8x1xi32>
    %292 = arith.cmpi slt, %291, %74 : vector<8x1xi32>
    %293 = vector.shape_cast %292 : vector<8x1xi1> to vector<8x1xi1>
    %294 = vector.broadcast %293 : vector<8x1xi1> to vector<8x16xi1>
    %295 = arith.select %294, %290, %258 : vector<8x16xi1>, vector<8x16xf32>
    %c3_i32_109 = arith.constant 3 : i32
    %296 = arith.index_cast %c3_i32_109 : i32 to index
    %c0_110 = arith.constant 0 : index
    %c0_111 = arith.constant 0 : index
    %297 = vector.load %arg24[%296, %c0_110, %c0_111] : memref<8x8x48xf32, #tpu.memory_space<vmem>>, vector<1x8x48xf32>
    %298 = vector.shape_cast %297 : vector<1x8x48xf32> to vector<8x48xf32>
    %cst_112 = arith.constant dense<0.000000e+00> : vector<8x48xf32>
    %299 = tpu.matmul %295, %182, %cst_112 {dimension_numbers = #tpu.dot_dimension_numbers<[1], [0], [0], [1], [0, 0, 1, 1], [], []>} : vector<8x16xf32>, vector<16x48xf32>, vector<8x48xf32> -> vector<8x48xf32>
    %300 = vector.extract_strided_slice %298 {offsets = [0, 0], sizes = [8, 16], strides = [1, 1]} : vector<8x48xf32> to vector<8x16xf32>
    %301 = vector.extract_strided_slice %299 {offsets = [0, 0], sizes = [8, 16], strides = [1, 1]} : vector<8x48xf32> to vector<8x16xf32>
    %302 = arith.addf %300, %301 : vector<8x16xf32>
    %303 = arith.negf %302 : vector<8x16xf32>
    %304 = math.exp %303 : vector<8x16xf32>
    %cst_113 = arith.constant 1.000000e+00 : f32
    %305 = vector.broadcast %cst_113 : f32 to vector<8x16xf32>
    %306 = arith.addf %305, %304 : vector<8x16xf32>
    %307 = arith.divf %305, %306 : vector<8x16xf32>
    %308 = vector.extract_strided_slice %298 {offsets = [0, 16], sizes = [8, 16], strides = [1, 1]} : vector<8x48xf32> to vector<8x16xf32>
    %309 = vector.extract_strided_slice %299 {offsets = [0, 16], sizes = [8, 16], strides = [1, 1]} : vector<8x48xf32> to vector<8x16xf32>
    %310 = arith.addf %308, %309 : vector<8x16xf32>
    %311 = arith.negf %310 : vector<8x16xf32>
    %312 = math.exp %311 : vector<8x16xf32>
    %cst_114 = arith.constant 1.000000e+00 : f32
    %313 = vector.broadcast %cst_114 : f32 to vector<8x16xf32>
    %314 = arith.addf %313, %312 : vector<8x16xf32>
    %315 = arith.divf %313, %314 : vector<8x16xf32>
    %316 = vector.extract_strided_slice %298 {offsets = [0, 32], sizes = [8, 16], strides = [1, 1]} : vector<8x48xf32> to vector<8x16xf32>
    %317 = vector.extract_strided_slice %299 {offsets = [0, 32], sizes = [8, 16], strides = [1, 1]} : vector<8x48xf32> to vector<8x16xf32>
    %318 = vector.broadcast %183 : vector<1x16xf32> to vector<8x16xf32>
    %319 = arith.addf %317, %318 : vector<8x16xf32>
    %320 = arith.mulf %307, %319 : vector<8x16xf32>
    %321 = arith.addf %316, %320 : vector<8x16xf32>
    %322 = math.tanh %321 : vector<8x16xf32>
    %cst_115 = arith.constant 1.000000e+00 : f32
    %323 = vector.broadcast %cst_115 : f32 to vector<8x16xf32>
    %324 = arith.subf %323, %315 : vector<8x16xf32>
    %325 = arith.mulf %324, %322 : vector<8x16xf32>
    %326 = arith.mulf %315, %295 : vector<8x16xf32>
    %327 = arith.addf %325, %326 : vector<8x16xf32>
    %328 = vector.broadcast %c3_i32_109 : i32 to vector<8x1xi32>
    %329 = arith.cmpi slt, %328, %74 : vector<8x1xi32>
    %330 = vector.shape_cast %329 : vector<8x1xi1> to vector<8x1xi1>
    %331 = vector.broadcast %330 : vector<8x1xi1> to vector<8x16xi1>
    %332 = arith.select %331, %327, %295 : vector<8x16xi1>, vector<8x16xf32>
    %c4_i32_116 = arith.constant 4 : i32
    %333 = arith.index_cast %c4_i32_116 : i32 to index
    %c0_117 = arith.constant 0 : index
    %c0_118 = arith.constant 0 : index
    %334 = vector.load %arg24[%333, %c0_117, %c0_118] : memref<8x8x48xf32, #tpu.memory_space<vmem>>, vector<1x8x48xf32>
    %335 = vector.shape_cast %334 : vector<1x8x48xf32> to vector<8x48xf32>
    %cst_119 = arith.constant dense<0.000000e+00> : vector<8x48xf32>
    %336 = tpu.matmul %332, %182, %cst_119 {dimension_numbers = #tpu.dot_dimension_numbers<[1], [0], [0], [1], [0, 0, 1, 1], [], []>} : vector<8x16xf32>, vector<16x48xf32>, vector<8x48xf32> -> vector<8x48xf32>
    %337 = vector.extract_strided_slice %335 {offsets = [0, 0], sizes = [8, 16], strides = [1, 1]} : vector<8x48xf32> to vector<8x16xf32>
    %338 = vector.extract_strided_slice %336 {offsets = [0, 0], sizes = [8, 16], strides = [1, 1]} : vector<8x48xf32> to vector<8x16xf32>
    %339 = arith.addf %337, %338 : vector<8x16xf32>
    %340 = arith.negf %339 : vector<8x16xf32>
    %341 = math.exp %340 : vector<8x16xf32>
    %cst_120 = arith.constant 1.000000e+00 : f32
    %342 = vector.broadcast %cst_120 : f32 to vector<8x16xf32>
    %343 = arith.addf %342, %341 : vector<8x16xf32>
    %344 = arith.divf %342, %343 : vector<8x16xf32>
    %345 = vector.extract_strided_slice %335 {offsets = [0, 16], sizes = [8, 16], strides = [1, 1]} : vector<8x48xf32> to vector<8x16xf32>
    %346 = vector.extract_strided_slice %336 {offsets = [0, 16], sizes = [8, 16], strides = [1, 1]} : vector<8x48xf32> to vector<8x16xf32>
    %347 = arith.addf %345, %346 : vector<8x16xf32>
    %348 = arith.negf %347 : vector<8x16xf32>
    %349 = math.exp %348 : vector<8x16xf32>
    %cst_121 = arith.constant 1.000000e+00 : f32
    %350 = vector.broadcast %cst_121 : f32 to vector<8x16xf32>
    %351 = arith.addf %350, %349 : vector<8x16xf32>
    %352 = arith.divf %350, %351 : vector<8x16xf32>
    %353 = vector.extract_strided_slice %335 {offsets = [0, 32], sizes = [8, 16], strides = [1, 1]} : vector<8x48xf32> to vector<8x16xf32>
    %354 = vector.extract_strided_slice %336 {offsets = [0, 32], sizes = [8, 16], strides = [1, 1]} : vector<8x48xf32> to vector<8x16xf32>
    %355 = vector.broadcast %183 : vector<1x16xf32> to vector<8x16xf32>
    %356 = arith.addf %354, %355 : vector<8x16xf32>
    %357 = arith.mulf %344, %356 : vector<8x16xf32>
    %358 = arith.addf %353, %357 : vector<8x16xf32>
    %359 = math.tanh %358 : vector<8x16xf32>
    %cst_122 = arith.constant 1.000000e+00 : f32
    %360 = vector.broadcast %cst_122 : f32 to vector<8x16xf32>
    %361 = arith.subf %360, %352 : vector<8x16xf32>
    %362 = arith.mulf %361, %359 : vector<8x16xf32>
    %363 = arith.mulf %352, %332 : vector<8x16xf32>
    %364 = arith.addf %362, %363 : vector<8x16xf32>
    %365 = vector.broadcast %c4_i32_116 : i32 to vector<8x1xi32>
    %366 = arith.cmpi slt, %365, %74 : vector<8x1xi32>
    %367 = vector.shape_cast %366 : vector<8x1xi1> to vector<8x1xi1>
    %368 = vector.broadcast %367 : vector<8x1xi1> to vector<8x16xi1>
    %369 = arith.select %368, %364, %332 : vector<8x16xi1>, vector<8x16xf32>
    %c5_i32_123 = arith.constant 5 : i32
    %370 = arith.index_cast %c5_i32_123 : i32 to index
    %c0_124 = arith.constant 0 : index
    %c0_125 = arith.constant 0 : index
    %371 = vector.load %arg24[%370, %c0_124, %c0_125] : memref<8x8x48xf32, #tpu.memory_space<vmem>>, vector<1x8x48xf32>
    %372 = vector.shape_cast %371 : vector<1x8x48xf32> to vector<8x48xf32>
    %cst_126 = arith.constant dense<0.000000e+00> : vector<8x48xf32>
    %373 = tpu.matmul %369, %182, %cst_126 {dimension_numbers = #tpu.dot_dimension_numbers<[1], [0], [0], [1], [0, 0, 1, 1], [], []>} : vector<8x16xf32>, vector<16x48xf32>, vector<8x48xf32> -> vector<8x48xf32>
    %374 = vector.extract_strided_slice %372 {offsets = [0, 0], sizes = [8, 16], strides = [1, 1]} : vector<8x48xf32> to vector<8x16xf32>
    %375 = vector.extract_strided_slice %373 {offsets = [0, 0], sizes = [8, 16], strides = [1, 1]} : vector<8x48xf32> to vector<8x16xf32>
    %376 = arith.addf %374, %375 : vector<8x16xf32>
    %377 = arith.negf %376 : vector<8x16xf32>
    %378 = math.exp %377 : vector<8x16xf32>
    %cst_127 = arith.constant 1.000000e+00 : f32
    %379 = vector.broadcast %cst_127 : f32 to vector<8x16xf32>
    %380 = arith.addf %379, %378 : vector<8x16xf32>
    %381 = arith.divf %379, %380 : vector<8x16xf32>
    %382 = vector.extract_strided_slice %372 {offsets = [0, 16], sizes = [8, 16], strides = [1, 1]} : vector<8x48xf32> to vector<8x16xf32>
    %383 = vector.extract_strided_slice %373 {offsets = [0, 16], sizes = [8, 16], strides = [1, 1]} : vector<8x48xf32> to vector<8x16xf32>
    %384 = arith.addf %382, %383 : vector<8x16xf32>
    %385 = arith.negf %384 : vector<8x16xf32>
    %386 = math.exp %385 : vector<8x16xf32>
    %cst_128 = arith.constant 1.000000e+00 : f32
    %387 = vector.broadcast %cst_128 : f32 to vector<8x16xf32>
    %388 = arith.addf %387, %386 : vector<8x16xf32>
    %389 = arith.divf %387, %388 : vector<8x16xf32>
    %390 = vector.extract_strided_slice %372 {offsets = [0, 32], sizes = [8, 16], strides = [1, 1]} : vector<8x48xf32> to vector<8x16xf32>
    %391 = vector.extract_strided_slice %373 {offsets = [0, 32], sizes = [8, 16], strides = [1, 1]} : vector<8x48xf32> to vector<8x16xf32>
    %392 = vector.broadcast %183 : vector<1x16xf32> to vector<8x16xf32>
    %393 = arith.addf %391, %392 : vector<8x16xf32>
    %394 = arith.mulf %381, %393 : vector<8x16xf32>
    %395 = arith.addf %390, %394 : vector<8x16xf32>
    %396 = math.tanh %395 : vector<8x16xf32>
    %cst_129 = arith.constant 1.000000e+00 : f32
    %397 = vector.broadcast %cst_129 : f32 to vector<8x16xf32>
    %398 = arith.subf %397, %389 : vector<8x16xf32>
    %399 = arith.mulf %398, %396 : vector<8x16xf32>
    %400 = arith.mulf %389, %369 : vector<8x16xf32>
    %401 = arith.addf %399, %400 : vector<8x16xf32>
    %402 = vector.broadcast %c5_i32_123 : i32 to vector<8x1xi32>
    %403 = arith.cmpi slt, %402, %74 : vector<8x1xi32>
    %404 = vector.shape_cast %403 : vector<8x1xi1> to vector<8x1xi1>
    %405 = vector.broadcast %404 : vector<8x1xi1> to vector<8x16xi1>
    %406 = arith.select %405, %401, %369 : vector<8x16xi1>, vector<8x16xf32>
    %c6_i32_130 = arith.constant 6 : i32
    %407 = arith.index_cast %c6_i32_130 : i32 to index
    %c0_131 = arith.constant 0 : index
    %c0_132 = arith.constant 0 : index
    %408 = vector.load %arg24[%407, %c0_131, %c0_132] : memref<8x8x48xf32, #tpu.memory_space<vmem>>, vector<1x8x48xf32>
    %409 = vector.shape_cast %408 : vector<1x8x48xf32> to vector<8x48xf32>
    %cst_133 = arith.constant dense<0.000000e+00> : vector<8x48xf32>
    %410 = tpu.matmul %406, %182, %cst_133 {dimension_numbers = #tpu.dot_dimension_numbers<[1], [0], [0], [1], [0, 0, 1, 1], [], []>} : vector<8x16xf32>, vector<16x48xf32>, vector<8x48xf32> -> vector<8x48xf32>
    %411 = vector.extract_strided_slice %409 {offsets = [0, 0], sizes = [8, 16], strides = [1, 1]} : vector<8x48xf32> to vector<8x16xf32>
    %412 = vector.extract_strided_slice %410 {offsets = [0, 0], sizes = [8, 16], strides = [1, 1]} : vector<8x48xf32> to vector<8x16xf32>
    %413 = arith.addf %411, %412 : vector<8x16xf32>
    %414 = arith.negf %413 : vector<8x16xf32>
    %415 = math.exp %414 : vector<8x16xf32>
    %cst_134 = arith.constant 1.000000e+00 : f32
    %416 = vector.broadcast %cst_134 : f32 to vector<8x16xf32>
    %417 = arith.addf %416, %415 : vector<8x16xf32>
    %418 = arith.divf %416, %417 : vector<8x16xf32>
    %419 = vector.extract_strided_slice %409 {offsets = [0, 16], sizes = [8, 16], strides = [1, 1]} : vector<8x48xf32> to vector<8x16xf32>
    %420 = vector.extract_strided_slice %410 {offsets = [0, 16], sizes = [8, 16], strides = [1, 1]} : vector<8x48xf32> to vector<8x16xf32>
    %421 = arith.addf %419, %420 : vector<8x16xf32>
    %422 = arith.negf %421 : vector<8x16xf32>
    %423 = math.exp %422 : vector<8x16xf32>
    %cst_135 = arith.constant 1.000000e+00 : f32
    %424 = vector.broadcast %cst_135 : f32 to vector<8x16xf32>
    %425 = arith.addf %424, %423 : vector<8x16xf32>
    %426 = arith.divf %424, %425 : vector<8x16xf32>
    %427 = vector.extract_strided_slice %409 {offsets = [0, 32], sizes = [8, 16], strides = [1, 1]} : vector<8x48xf32> to vector<8x16xf32>
    %428 = vector.extract_strided_slice %410 {offsets = [0, 32], sizes = [8, 16], strides = [1, 1]} : vector<8x48xf32> to vector<8x16xf32>
    %429 = vector.broadcast %183 : vector<1x16xf32> to vector<8x16xf32>
    %430 = arith.addf %428, %429 : vector<8x16xf32>
    %431 = arith.mulf %418, %430 : vector<8x16xf32>
    %432 = arith.addf %427, %431 : vector<8x16xf32>
    %433 = math.tanh %432 : vector<8x16xf32>
    %cst_136 = arith.constant 1.000000e+00 : f32
    %434 = vector.broadcast %cst_136 : f32 to vector<8x16xf32>
    %435 = arith.subf %434, %426 : vector<8x16xf32>
    %436 = arith.mulf %435, %433 : vector<8x16xf32>
    %437 = arith.mulf %426, %406 : vector<8x16xf32>
    %438 = arith.addf %436, %437 : vector<8x16xf32>
    %439 = vector.broadcast %c6_i32_130 : i32 to vector<8x1xi32>
    %440 = arith.cmpi slt, %439, %74 : vector<8x1xi32>
    %441 = vector.shape_cast %440 : vector<8x1xi1> to vector<8x1xi1>
    %442 = vector.broadcast %441 : vector<8x1xi1> to vector<8x16xi1>
    %443 = arith.select %442, %438, %406 : vector<8x16xi1>, vector<8x16xf32>
    %c7_i32_137 = arith.constant 7 : i32
    %444 = arith.index_cast %c7_i32_137 : i32 to index
    %c0_138 = arith.constant 0 : index
    %c0_139 = arith.constant 0 : index
    %445 = vector.load %arg24[%444, %c0_138, %c0_139] : memref<8x8x48xf32, #tpu.memory_space<vmem>>, vector<1x8x48xf32>
    %446 = vector.shape_cast %445 : vector<1x8x48xf32> to vector<8x48xf32>
    %cst_140 = arith.constant dense<0.000000e+00> : vector<8x48xf32>
    %447 = tpu.matmul %443, %182, %cst_140 {dimension_numbers = #tpu.dot_dimension_numbers<[1], [0], [0], [1], [0, 0, 1, 1], [], []>} : vector<8x16xf32>, vector<16x48xf32>, vector<8x48xf32> -> vector<8x48xf32>
    %448 = vector.extract_strided_slice %446 {offsets = [0, 0], sizes = [8, 16], strides = [1, 1]} : vector<8x48xf32> to vector<8x16xf32>
    %449 = vector.extract_strided_slice %447 {offsets = [0, 0], sizes = [8, 16], strides = [1, 1]} : vector<8x48xf32> to vector<8x16xf32>
    %450 = arith.addf %448, %449 : vector<8x16xf32>
    %451 = arith.negf %450 : vector<8x16xf32>
    %452 = math.exp %451 : vector<8x16xf32>
    %cst_141 = arith.constant 1.000000e+00 : f32
    %453 = vector.broadcast %cst_141 : f32 to vector<8x16xf32>
    %454 = arith.addf %453, %452 : vector<8x16xf32>
    %455 = arith.divf %453, %454 : vector<8x16xf32>
    %456 = vector.extract_strided_slice %446 {offsets = [0, 16], sizes = [8, 16], strides = [1, 1]} : vector<8x48xf32> to vector<8x16xf32>
    %457 = vector.extract_strided_slice %447 {offsets = [0, 16], sizes = [8, 16], strides = [1, 1]} : vector<8x48xf32> to vector<8x16xf32>
    %458 = arith.addf %456, %457 : vector<8x16xf32>
    %459 = arith.negf %458 : vector<8x16xf32>
    %460 = math.exp %459 : vector<8x16xf32>
    %cst_142 = arith.constant 1.000000e+00 : f32
    %461 = vector.broadcast %cst_142 : f32 to vector<8x16xf32>
    %462 = arith.addf %461, %460 : vector<8x16xf32>
    %463 = arith.divf %461, %462 : vector<8x16xf32>
    %464 = vector.extract_strided_slice %446 {offsets = [0, 32], sizes = [8, 16], strides = [1, 1]} : vector<8x48xf32> to vector<8x16xf32>
    %465 = vector.extract_strided_slice %447 {offsets = [0, 32], sizes = [8, 16], strides = [1, 1]} : vector<8x48xf32> to vector<8x16xf32>
    %466 = vector.broadcast %183 : vector<1x16xf32> to vector<8x16xf32>
    %467 = arith.addf %465, %466 : vector<8x16xf32>
    %468 = arith.mulf %455, %467 : vector<8x16xf32>
    %469 = arith.addf %464, %468 : vector<8x16xf32>
    %470 = math.tanh %469 : vector<8x16xf32>
    %cst_143 = arith.constant 1.000000e+00 : f32
    %471 = vector.broadcast %cst_143 : f32 to vector<8x16xf32>
    %472 = arith.subf %471, %463 : vector<8x16xf32>
    %473 = arith.mulf %472, %470 : vector<8x16xf32>
    %474 = arith.mulf %463, %443 : vector<8x16xf32>
    %475 = arith.addf %473, %474 : vector<8x16xf32>
    %476 = vector.broadcast %c7_i32_137 : i32 to vector<8x1xi32>
    %477 = arith.cmpi slt, %476, %74 : vector<8x1xi32>
    %478 = vector.shape_cast %477 : vector<8x1xi1> to vector<8x1xi1>
    %479 = vector.broadcast %478 : vector<8x1xi1> to vector<8x16xi1>
    %480 = arith.select %479, %475, %443 : vector<8x16xi1>, vector<8x16xf32>
    %c8_i32_144 = arith.constant 8 : i32
    %c0_145 = arith.constant 0 : index
    %c0_146 = arith.constant 0 : index
    %481 = vector.load %arg16[%c0_145, %c0_146] : memref<16x64xf32, #tpu.memory_space<vmem>>, vector<16x64xf32>
    %cst_147 = arith.constant dense<0.000000e+00> : vector<8x64xf32>
    %482 = tpu.matmul %480, %481, %cst_147 {dimension_numbers = #tpu.dot_dimension_numbers<[1], [0], [0], [1], [0, 0, 1, 1], [], []>} : vector<8x16xf32>, vector<16x64xf32>, vector<8x64xf32> -> vector<8x64xf32>
    %c0_148 = arith.constant 0 : index
    %c0_149 = arith.constant 0 : index
    %483 = vector.load %arg17[%c0_148, %c0_149] : memref<16x64xf32, #tpu.memory_space<vmem>>, vector<16x64xf32>
    %cst_150 = arith.constant dense<0.000000e+00> : vector<8x64xf32>
    %484 = tpu.matmul %181, %483, %cst_150 {dimension_numbers = #tpu.dot_dimension_numbers<[1], [0], [0], [1], [0, 0, 1, 1], [], []>} : vector<8x16xf32>, vector<16x64xf32>, vector<8x64xf32> -> vector<8x64xf32>
    %485 = arith.addf %482, %484 : vector<8x64xf32>
    %c0_151 = arith.constant 0 : index
    %c0_152 = arith.constant 0 : index
    %486 = vector.load %arg18[%c0_151, %c0_152] : memref<1x64xf32, #tpu.memory_space<vmem>>, vector<1x64xf32>
    %487 = vector.broadcast %486 : vector<1x64xf32> to vector<8x64xf32>
    %488 = arith.addf %485, %487 : vector<8x64xf32>
    %cst_153 = arith.constant 0.000000e+00 : f32
    %489 = vector.broadcast %cst_153 : f32 to vector<8x64xf32>
    %490 = arith.maximumf %488, %489 : vector<8x64xf32>
    %c0_154 = arith.constant 0 : index
    %c0_155 = arith.constant 0 : index
    %491 = vector.load %arg19[%c0_154, %c0_155] : memref<64x32xf32, #tpu.memory_space<vmem>>, vector<64x32xf32>
    %cst_156 = arith.constant dense<0.000000e+00> : vector<8x32xf32>
    %492 = tpu.matmul %490, %491, %cst_156 {dimension_numbers = #tpu.dot_dimension_numbers<[1], [0], [0], [1], [0, 0, 1, 1], [], []>} : vector<8x64xf32>, vector<64x32xf32>, vector<8x32xf32> -> vector<8x32xf32>
    %c0_157 = arith.constant 0 : index
    %c0_158 = arith.constant 0 : index
    %493 = vector.load %arg20[%c0_157, %c0_158] : memref<1x32xf32, #tpu.memory_space<vmem>>, vector<1x32xf32>
    %494 = vector.broadcast %493 : vector<1x32xf32> to vector<8x32xf32>
    %495 = arith.addf %492, %494 : vector<8x32xf32>
    %cst_159 = arith.constant 0.000000e+00 : f32
    %496 = vector.broadcast %cst_159 : f32 to vector<8x32xf32>
    %497 = arith.maximumf %495, %496 : vector<8x32xf32>
    %c0_160 = arith.constant 0 : index
    %c0_161 = arith.constant 0 : index
    %498 = vector.load %arg21[%c0_160, %c0_161] : memref<32x1xf32, #tpu.memory_space<vmem>>, vector<32x1xf32>
    %cst_162 = arith.constant dense<0.000000e+00> : vector<8x1xf32>
    %499 = tpu.matmul %497, %498, %cst_162 {dimension_numbers = #tpu.dot_dimension_numbers<[1], [0], [0], [1], [0, 0, 1, 1], [], []>} : vector<8x32xf32>, vector<32x1xf32>, vector<8x1xf32> -> vector<8x1xf32>
    %c0_163 = arith.constant 0 : index
    %c0_164 = arith.constant 0 : index
    %500 = vector.load %arg22[%c0_163, %c0_164] : memref<1x1xf32, #tpu.memory_space<vmem>>, vector<1x1xf32>
    %501 = vector.broadcast %500 : vector<1x1xf32> to vector<8x1xf32>
    %502 = arith.addf %499, %501 : vector<8x1xf32>
    %503 = arith.negf %502 : vector<8x1xf32>
    %504 = math.exp %503 : vector<8x1xf32>
    %cst_165 = arith.constant 1.000000e+00 : f32
    %505 = vector.broadcast %cst_165 : f32 to vector<8x1xf32>
    %506 = arith.addf %505, %504 : vector<8x1xf32>
    %507 = arith.divf %505, %506 : vector<8x1xf32>
    %c0_166 = arith.constant 0 : index
    %c0_167 = arith.constant 0 : index
    %508 = vector.load %arg23[%c0_166, %c0_167] : memref<8x1xf32, #tpu.memory_space<vmem>>, vector<8x1xf32>
    tpu.vector_store %arg23[%c0_166, %c0_167], %507 {strides = array<i32>} : memref<8x1xf32, #tpu.memory_space<vmem>>, vector<8x1xf32>,
    return
  }
  func.func @transform_0(%arg0: i32, %arg1: memref<8xi32, #tpu.memory_space<smem>>) -> (i32, i32, i32) {
    %c0_i32 = arith.constant 0 : i32
    %c0_i32_0 = arith.constant 0 : i32
    %c0_i32_1 = arith.constant 0 : i32
    return %c0_i32, %arg0, %c0_i32_0 : i32, i32, i32
  }
  func.func @transform_1(%arg0: i32, %arg1: memref<8xi32, #tpu.memory_space<smem>>) -> (i32, i32) {
    %c0_i32 = arith.constant 0 : i32
    %c0_i32_0 = arith.constant 0 : i32
    return %arg0, %c0_i32 : i32, i32
  }
  func.func @transform_2(%arg0: i32, %arg1: memref<8xi32, #tpu.memory_space<smem>>) -> (i32, i32) {
    %c0_i32 = arith.constant 0 : i32
    %c0_i32_0 = arith.constant 0 : i32
    %c0_i32_1 = arith.constant 0 : i32
    return %c0_i32, %c0_i32_0 : i32, i32
  }
  func.func @transform_3(%arg0: i32, %arg1: memref<8xi32, #tpu.memory_space<smem>>) -> (i32, i32) {
    %c0_i32 = arith.constant 0 : i32
    %c0_i32_0 = arith.constant 0 : i32
    %c0_i32_1 = arith.constant 0 : i32
    return %c0_i32, %c0_i32_0 : i32, i32
  }
  func.func @transform_4(%arg0: i32, %arg1: memref<8xi32, #tpu.memory_space<smem>>) -> (i32, i32) {
    %c0_i32 = arith.constant 0 : i32
    %c0_i32_0 = arith.constant 0 : i32
    %c0_i32_1 = arith.constant 0 : i32
    return %c0_i32, %c0_i32_0 : i32, i32
  }
  func.func @transform_5(%arg0: i32, %arg1: memref<8xi32, #tpu.memory_space<smem>>) -> (i32, i32) {
    %c0_i32 = arith.constant 0 : i32
    %c0_i32_0 = arith.constant 0 : i32
    %c0_i32_1 = arith.constant 0 : i32
    return %c0_i32, %c0_i32_0 : i32, i32
  }
  func.func @transform_6(%arg0: i32, %arg1: memref<8xi32, #tpu.memory_space<smem>>) -> (i32, i32) {
    %c0_i32 = arith.constant 0 : i32
    %c0_i32_0 = arith.constant 0 : i32
    %c0_i32_1 = arith.constant 0 : i32
    return %c0_i32, %c0_i32_0 : i32, i32
  }
  func.func @transform_7(%arg0: i32, %arg1: memref<8xi32, #tpu.memory_space<smem>>) -> (i32, i32) {
    %c0_i32 = arith.constant 0 : i32
    %c0_i32_0 = arith.constant 0 : i32
    %c0_i32_1 = arith.constant 0 : i32
    return %c0_i32, %c0_i32_0 : i32, i32
  }
  func.func @transform_8(%arg0: i32, %arg1: memref<8xi32, #tpu.memory_space<smem>>) -> (i32, i32) {
    %c0_i32 = arith.constant 0 : i32
    %c0_i32_0 = arith.constant 0 : i32
    %c0_i32_1 = arith.constant 0 : i32
    return %c0_i32, %c0_i32_0 : i32, i32
  }
  func.func @transform_9(%arg0: i32, %arg1: memref<8xi32, #tpu.memory_space<smem>>) -> (i32, i32) {
    %c0_i32 = arith.constant 0 : i32
    %c0_i32_0 = arith.constant 0 : i32
    %c0_i32_1 = arith.constant 0 : i32
    return %c0_i32, %c0_i32_0 : i32, i32
  }
  func.func @transform_10(%arg0: i32, %arg1: memref<8xi32, #tpu.memory_space<smem>>) -> (i32, i32) {
    %c0_i32 = arith.constant 0 : i32
    %c0_i32_0 = arith.constant 0 : i32
    %c0_i32_1 = arith.constant 0 : i32
    return %c0_i32, %c0_i32_0 : i32, i32
  }
  func.func @transform_11(%arg0: i32, %arg1: memref<8xi32, #tpu.memory_space<smem>>) -> (i32, i32) {
    %c0_i32 = arith.constant 0 : i32
    %c0_i32_0 = arith.constant 0 : i32
    %c0_i32_1 = arith.constant 0 : i32
    return %c0_i32, %c0_i32_0 : i32, i32
  }
  func.func @transform_12(%arg0: i32, %arg1: memref<8xi32, #tpu.memory_space<smem>>) -> (i32, i32) {
    %c0_i32 = arith.constant 0 : i32
    %c0_i32_0 = arith.constant 0 : i32
    %c0_i32_1 = arith.constant 0 : i32
    return %c0_i32, %c0_i32_0 : i32, i32
  }
  func.func @transform_13(%arg0: i32, %arg1: memref<8xi32, #tpu.memory_space<smem>>) -> (i32, i32) {
    %c0_i32 = arith.constant 0 : i32
    %c0_i32_0 = arith.constant 0 : i32
    %c0_i32_1 = arith.constant 0 : i32
    return %c0_i32, %c0_i32_0 : i32, i32
  }
  func.func @transform_14(%arg0: i32, %arg1: memref<8xi32, #tpu.memory_space<smem>>) -> (i32, i32) {
    %c0_i32 = arith.constant 0 : i32
    %c0_i32_0 = arith.constant 0 : i32
    %c0_i32_1 = arith.constant 0 : i32
    return %c0_i32, %c0_i32_0 : i32, i32
  }
  func.func @transform_15(%arg0: i32, %arg1: memref<8xi32, #tpu.memory_space<smem>>) -> (i32, i32) {
    %c0_i32 = arith.constant 0 : i32
    %c0_i32_0 = arith.constant 0 : i32
    %c0_i32_1 = arith.constant 0 : i32
    return %c0_i32, %c0_i32_0 : i32, i32
  }
  func.func @transform_16(%arg0: i32, %arg1: memref<8xi32, #tpu.memory_space<smem>>) -> (i32, i32) {
    %c0_i32 = arith.constant 0 : i32
    %c0_i32_0 = arith.constant 0 : i32
    %c0_i32_1 = arith.constant 0 : i32
    return %c0_i32, %c0_i32_0 : i32, i32
  }
  func.func @transform_17(%arg0: i32, %arg1: memref<8xi32, #tpu.memory_space<smem>>) -> (i32, i32) {
    %c0_i32 = arith.constant 0 : i32
    %c0_i32_0 = arith.constant 0 : i32
    %c0_i32_1 = arith.constant 0 : i32
    return %c0_i32, %c0_i32_0 : i32, i32
  }
  func.func @transform_18(%arg0: i32, %arg1: memref<8xi32, #tpu.memory_space<smem>>) -> (i32, i32) {
    %c0_i32 = arith.constant 0 : i32
    %c0_i32_0 = arith.constant 0 : i32
    %c0_i32_1 = arith.constant 0 : i32
    return %c0_i32, %c0_i32_0 : i32, i32
  }
  func.func @transform_19(%arg0: i32, %arg1: memref<8xi32, #tpu.memory_space<smem>>) -> (i32, i32) {
    %c0_i32 = arith.constant 0 : i32
    %c0_i32_0 = arith.constant 0 : i32
    %c0_i32_1 = arith.constant 0 : i32
    return %c0_i32, %c0_i32_0 : i32, i32
  }
  func.func @transform_20(%arg0: i32, %arg1: memref<8xi32, #tpu.memory_space<smem>>) -> (i32, i32) {
    %c0_i32 = arith.constant 0 : i32
    %c0_i32_0 = arith.constant 0 : i32
    %c0_i32_1 = arith.constant 0 : i32
    return %c0_i32, %c0_i32_0 : i32, i32
  }
  func.func @transform_21(%arg0: i32, %arg1: memref<8xi32, #tpu.memory_space<smem>>) -> (i32, i32) {
    %c0_i32 = arith.constant 0 : i32
    %c0_i32_0 = arith.constant 0 : i32
    return %arg0, %c0_i32 : i32, i32
  }
}

</mosaic_0001>

<bundles_post_ra>
// kernel: tpu_custom_call.1
= control target key start
LH: loop header
LB: loop body
LE: loop exit
PB: predicated region body
PF: predicated region fallthrough
CT: control target
= control target key end

     0   :  { %s4100_s0 = inlined_call_operand.hbm [shape: s32[8], index: 0, kind: input, shape index: {}]   ;;  %s4101_s1 = inlined_call_operand.vmem [shape: f32[8,8,13], index: 1, kind: input, shape index: {}]   ;;  %s4102_s2 = inlined_call_operand.vmem [shape: s32[8,1], index: 2, kind: input, shape index: {}]   ;;  %s4103_s3 = inlined_call_operand.vmem [shape: f32[10,17], index: 3, kind: input, shape index: {}]   ;;  %s4104_s4 = inlined_call_operand.hbm [shape: f32[12,17], index: 4, kind: input, shape index: {}]   ;;  %s4105_s5 = inlined_call_operand.hbm [shape: f32[1,17], index: 5, kind: input, shape index: {}]   ;;  %s4106_s6 = inlined_call_operand.vmem [shape: f32[1,17], index: 6, kind: input, shape index: {}]   ;;  %s4107_s7 = inlined_call_operand.vmem [shape: f32[1,17], index: 7, kind: input, shape index: {}]   ;;  %s4108_s8 = inlined_call_operand.vmem [shape: f32[17,48], index: 8, kind: input, shape index: {}]   ;;  %s4109_s9 = inlined_call_operand.hbm [shape: f32[1,48], index: 9, kind: input, shape index: {}]   ;;  %s4110_s10 = inlined_call_operand.vmem [shape: f32[16,48], index: 10, kind: input, shape index: {}]   ;;  %s4111_s11 = inlined_call_operand.hbm [shape: f32[1,16], index: 11, kind: input, shape index: {}]   ;;  %s4112_s12 = inlined_call_operand.vmem [shape: f32[17,48], index: 12, kind: input, shape index: {}]   ;;  %s4113_s13 = inlined_call_operand.hbm [shape: f32[1,48], index: 13, kind: input, shape index: {}]   ;;  %s4114_s14 = inlined_call_operand.hbm [shape: f32[1,16], index: 14, kind: input, shape index: {}]   ;;  %s4115_s15 = inlined_call_operand.vmem [shape: f32[16,64], index: 15, kind: input, shape index: {}]   ;;  %s4116_s16 = inlined_call_operand.hbm [shape: f32[16,64], index: 16, kind: input, shape index: {}]   ;;  %s4117_s17 = inlined_call_operand.vmem [shape: f32[1,64], index: 17, kind: input, shape index: {}]   ;;  %s4118_s18 = inlined_call_operand.vmem [shape: f32[64,32], index: 18, kind: input, shape index: {}]   ;;  %s4119_s19 = inlined_call_operand.vmem [shape: f32[1,32], index: 19, kind: input, shape index: {}]   ;;  %s4120_s20 = inlined_call_operand.vmem [shape: f32[32,1], index: 20, kind: input, shape index: {}]   ;;  %s4121_s22 = inlined_call_operand.vmem [shape: f32[8,1], index: 22, kind: output, shape index: {}]   ;;  %s4122_s21 = inlined_call_operand.<no memory space> [shape: f32[1,1], index: 21, kind: input, shape index: {}]  }
   0x1   :  { %4129 = sst [smem:[#allocation23_spill]] %s4100_s0 }
   0x2   :  { %4130 = sst [smem:[#allocation24_spill]] %s4101_s1  ;;  %s4137_s29 = sld [smem:[#allocation23_spill]] }
   0x3   :  { %4131 = sst [smem:[#allocation25_spill]] %s4102_s2 }
   0x4   :  { %4132 = sst [smem:[#allocation26_spill]] %s4103_s3 }
   0x5   :  { %4133 = sst [smem:[#allocation27_spill]] %s4104_s4 }
   0x6   :  { %4134 = sst [smem:[#allocation28_spill]] %s4105_s5 }
   0x7   :  { %4135 = sst [smem:[#allocation29_spill]] %s4106_s6 }
   0x8   :  { %4136 = sst [smem:[#allocation30_spill]] %s4115_s15  ;;  %s3067_s15 = scalar_lea.hbm %s4137_s29, 16 }
   0x9   :  { %p3068_p0 = scmp.ne.s32.totalorder %s4137_s29, %s3067_s15  ;;  %p3071_p1 = scmp.lt.u32.totalorder %s3067_s15, %s4137_s29 }
   0xb   :  { %p3073_p2 = pnand %p3071_p1, %p3068_p0 }
   0xd   :  { %3076 = shalt.err (!%p3073_p2)  }
   0xe   :  { %s3241_s1 = smov [#allocation5]   ;;  %v29_v0 = vstv %s4122_s21 }
   0xf   :  { %28 = dma.hbm_to_smem %s4137_s29, 16, %s3241_s1, [#allocation4]  ;;  %30 = vst [vmem:[#allocation6] sm:$0x1] %v29_v0 }
  0x10   :  { %3231 = dma.done.wait [#allocation4], 16 }
  0x11   :  { %3232 = vsyncadd [#allocation4], 4294967280 }
  0x12   :  { %32 = sfence }
  0x13   :  { %33 = vsyncpa [#allocation8], 0 }
  0x14   :  { %34 = vsyncpa [#allocation10], 0 }
  0x15   :  { %35 = vsyncpa [#allocation13], 0 }
  0x16   :  { %36 = vsyncpa [#allocation16], 0  ;;  %s3242_s15 = smov [#allocation9]   ;;  %s3243_s2 = smov [#allocation12]  }
  0x17   :  { %s61_s26 = sshll.u32 %s3242_s15, 4  ;;  %s89_s27 = sshll.u32 %s3243_s2, 4  ;;  %s62_s26 = int_to_ptr.vmem [resolvable:$true] %s61_s26  ;;  %s90_s27 = int_to_ptr.vmem [resolvable:$true] %s89_s27 }
  0x18   :  { %s4138_s29 = sld [smem:[#allocation28_spill]] }
  0x1e   :  { %s3077_s30 = scalar_lea.hbm %s4138_s29, 16 }
  0x1f   :  { %p3078_p3 = scmp.ne.s32.totalorder %s4138_s29, %s3077_s30  ;;  %p3081_p4 = scmp.lt.u32.totalorder %s3077_s30, %s4138_s29 }
  0x21   :  { %p3083_p5 = pnand %p3081_p4, %p3078_p3 }
  0x23   :  { %3086 = shalt.err (!%p3083_p5)
}
  0x24   :  { %s3087_s1 = scalar_lea.vmem %s62_s26, 16  ;;  %s3091_s5 = scalar_lea.vmem %s62_s26, 32 }
  0x25   :  { %p3088_p6 = scmp.ne.s32.totalorder %s62_s26, %s3087_s1  ;;  %p3092_p7 = scmp.lt.s32.totalorder %s62_s26, %s62_s26 }
  0x26   :  { %p3093_p8 = scmp.lt.s32.totalorder %s3091_s5, %s3087_s1 }
  0x28   :  { %p3094_p9 = por %p3093_p8, %p3092_p7 }
  0x2a   :  { %p3095_p10 = pnand %p3094_p9, %p3088_p6 }
  0x2c   :  { %3098 = shalt.err (!%p3095_p10)
}
  0x2d   :  { %64 = dma.hbm_to_vmem [thread:$0]  %s4138_s29, 16, %s62_s26, [#allocation10]  }
  0x2e   :  { %s3099_s2 = scalar_lea.hbm %s4111_s11, 16 }
  0x2f   :  { %p3100_p11 = scmp.ne.s32.totalorder %s4111_s11, %s3099_s2  ;;  %p3103_p12 = scmp.lt.u32.totalorder %s3099_s2, %s4111_s11 }
  0x31   :  { %p3105_p13 = pnand %p3103_p12, %p3100_p11 }
  0x33   :  { %3108 = shalt.err (!%p3105_p13)
}
  0x34   :  { %s3109_s21 = scalar_lea.vmem %s90_s27, 16  ;;  %s3113_s0 = scalar_lea.vmem %s90_s27, 32 }
  0x35   :  { %p3110_p0 = scmp.ne.s32.totalorder %s90_s27, %s3109_s21  ;;  %p3114_p1 = scmp.lt.s32.totalorder %s90_s27, %s90_s27 }
  0x36   :  { %p3115_p2 = scmp.lt.s32.totalorder %s3113_s0, %s3109_s21 }
  0x38   :  { %p3116_p3 = por %p3115_p2, %p3114_p1 }
  0x3a   :  { %p3117_p4 = pnand %p3116_p3, %p3110_p0 }
  0x3c   :  { %3120 = shalt.err (!%p3117_p4)
}
  0x3d   :  { %92 = dma.hbm_to_vmem [thread:$0]  %s4111_s11, 16, %s90_s27, [#allocation13]  }
  0x3e   :  { %s3244_s23 = smov [#allocation15]   ;;  %s3245_s5 = smov [#allocation7]  }
  0x3f   :  { %s111_s1 = sshll.u32 %s3244_s23, 4  ;;  %s48_s24 = sshll.u32 %s3245_s5, 4  ;;  %s112_s1 = int_to_ptr.vmem [resolvable:$true] %s111_s1  ;;  %s3415_s24 = int_to_ptr.vmem [resolvable:$true] %s48_s24 }
  0x40   :  { %s3121_s15 = scalar_lea.hbm %s4114_s14, 16 }
  0x41   :  { %p3122_p5 = scmp.ne.s32.totalorder %s4114_s14, %s3121_s15  ;;  %p3125_p6 = scmp.lt.u32.totalorder %s3121_s15, %s4114_s14 }
  0x43   :  { %p3127_p7 = pnand %p3125_p6, %p3122_p5 }
  0x45   :  { %3130 = shalt.err (!%p3127_p7)
}
  0x46   :  { %s3131_s11 = scalar_lea.vmem %s112_s1, 16  ;;  %s3135_s27 = scalar_lea.vmem %s112_s1, 32 }
  0x47   :  { %p3132_p8 = scmp.ne.s32.totalorder %s112_s1, %s3131_s11  ;;  %p3136_p9 = scmp.lt.s32.totalorder %s112_s1, %s112_s1 }
  0x48   :  { %p3137_p10 = scmp.lt.s32.totalorder %s3135_s27, %s3131_s11 }
  0x4a   :  { %p3138_p11 = por %p3137_p10, %p3136_p9 }
  0x4c   :  { %p3139_p12 = pnand %p3138_p11, %p3132_p8 }
  0x4e   :  { %3142 = shalt.err (!%p3139_p12)
}
  0x4f   :  { %114 = dma.hbm_to_vmem [thread:$0]  %s4114_s14, 16, %s112_s1, [#allocation16]  }
  0x50   :  { %s4139_s29 = sld [smem:[#allocation27_spill]] }
  0x56   :  { %s3143_s23 = scalar_lea.hbm %s4139_s29, 256 }
  0x57   :  { %p3144_p13 = scmp.ne.s32.totalorder %s4139_s29, %s3143_s23  ;;  %p3147_p0 = scmp.lt.u32.totalorder %s3143_s23, %s4139_s29 }
  0x59   :  { %p3149_p1 = pnand %p3147_p0, %p3144_p13 }
  0x5b   :  { %3152 = shalt.err (!%p3149_p1)
}
  0x5c   :  { %s3153_s2 = scalar_lea.vmem %s3415_s24, 256  ;;  %p3158_p3 = scmp.lt.s32.totalorder %s3415_s24, %s3415_s24 }
  0x5d   :  { %p3154_p2 = scmp.ne.s32.totalorder %s3415_s24, %s3153_s2  ;;  %p3159_p4 = scmp.lt.s32.totalorder %s3153_s2, %s3153_s2 }
  0x5f   :  { %p3160_p5 = por %p3159_p4, %p3158_p3 }
  0x61   :  { %p3161_p6 = pnand %p3160_p5, %p3154_p2 }
  0x63   :  { %3164 = shalt.err (!%p3161_p6)
}
  0x64   :  { %s3246_s14 = smov 128   ;;  %s3247_s1 = smov 8  }
  0x65   :  { %54 = dma.hbm_to_vmem [thread:$0]  %s4139_s29, 256, %s3415_s24, [#allocation8], %s3246_s14, %s3246_s14, %s3247_s1  }
  0x66   :  { %s3248_s30 = smov [#allocation11]   ;;  %s3249_s27 = smov [#allocation14]  }
  0x67   :  { %s77_s11 = sshll.u32 %s3248_s30, 4  ;;  %s101_s4 = sshll.u32 %s3249_s27, 4  ;;  %s78_s11 = int_to_ptr.vmem [resolvable:$true] %s77_s11  ;;  %s102_s4 = int_to_ptr.vmem [resolvable:$true] %s101_s4 }
  0x68   :  { %s3165_s26 = scalar_lea.hbm %s4109_s9, 16 }
  0x69   :  { %p3166_p7 = scmp.ne.s32.totalorder %s4109_s9, %s3165_s26  ;;  %p3169_p8 = scmp.lt.u32.totalorder %s3165_s26, %s4109_s9 }
  0x6b   :  { %p3171_p9 = pnand %p3169_p8, %p3166_p7 }
  0x6d   :  { %3174 = shalt.err (!%p3171_p9)
}
  0x6e   :  { %s3175_s24 = scalar_lea.vmem %s78_s11, 16  ;;  %s3179_s29 = scalar_lea.vmem %s78_s11, 32 }
  0x6f   :  { %p3176_p10 = scmp.ne.s32.totalorder %s78_s11, %s3175_s24  ;;  %p3180_p11 = scmp.lt.s32.totalorder %s78_s11, %s78_s11 }
  0x70   :  { %p3181_p12 = scmp.lt.s32.totalorder %s3179_s29, %s3175_s24 }
  0x72   :  { %p3182_p13 = por %p3181_p12, %p3180_p11 }
  0x74   :  { %p3183_p0 = pnand %p3182_p13, %p3176_p10 }
  0x76   :  { %3186 = shalt.err (!%p3183_p0)
}
  0x77   :  { %80 = dma.hbm_to_vmem [thread:$0]  %s4109_s9, 16, %s78_s11, [#allocation10]  }
  0x78   :  { %s3187_s30 = scalar_lea.hbm %s4113_s13, 16 }
  0x79   :  { %p3188_p1 = scmp.ne.s32.totalorder %s4113_s13, %s3187_s30  ;;  %p3191_p2 = scmp.lt.u32.totalorder %s3187_s30, %s4113_s13 }
  0x7b   :  { %p3193_p3 = pnand %p3191_p2, %p3188_p1 }
  0x7d   :  { %3196 = shalt.err (!%p3193_p3)
}
  0x7e   :  { %s3197_s23 = scalar_lea.vmem %s102_s4, 16  ;;  %s3201_s5 = scalar_lea.vmem %s102_s4, 32 }
  0x7f   :  { %p3198_p4 = scmp.ne.s32.totalorder %s102_s4, %s3197_s23  ;;  %p3202_p5 = scmp.lt.s32.totalorder %s102_s4, %s102_s4 }
  0x80   :  { %p3203_p6 = scmp.lt.s32.totalorder %s3201_s5, %s3197_s23 }
  0x82   :  { %p3204_p7 = por %p3203_p6, %p3202_p5 }
  0x84   :  { %p3205_p8 = pnand %p3204_p7, %p3198_p4 }
  0x86   :  { %3208 = shalt.err (!%p3205_p8)
}
  0x87   :  { %104 = dma.hbm_to_vmem [thread:$0]  %s4113_s13, 16, %s102_s4, [#allocation13]  }
  0x88   :  { %s3250_s6 = smov [#allocation17]   ;;  %s3209_s15 = scalar_lea.hbm %s4116_s16, 256 }
  0x89   :  { %s122_s25 = sshll.u32 %s3250_s6, 4  ;;  %p3210_p9 = scmp.ne.s32.totalorder %s4116_s16, %s3209_s15  ;;  %s123_s25 = int_to_ptr.vmem [resolvable:$true] %s122_s25 }
  0x8a   :  { %p3213_p10 = scmp.lt.u32.totalorder %s3209_s15, %s4116_s16 }
  0x8c   :  { %p3215_p11 = pnand %p3213_p10, %p3210_p9 }
  0x8e   :  { %3218 = shalt.err (!%p3215_p11)
}
  0x8f   :  { %s3219_s27 = scalar_lea.vmem %s123_s25, 256  ;;  %p3224_p13 = scmp.lt.s32.totalorder %s123_s25, %s123_s25 }
  0x90   :  { %p3220_p12 = scmp.ne.s32.totalorder %s123_s25, %s3219_s27  ;;  %p3225_p0 = scmp.lt.s32.totalorder %s3219_s27, %s3219_s27 }
  0x92   :  { %p3226_p1 = por %p3225_p0, %p3224_p13 }
  0x94   :  { %p3227_p2 = pnand %p3226_p1, %p3220_p12 }
  0x96   :  { %3230 = shalt.err (!%p3227_p2)
}
  0x97   :  { %128 = dma.hbm_to_vmem [thread:$0]  %s4116_s16, 256, %s123_s25, [#allocation16], %s3246_s14, %s3246_s14, %s3247_s1  }
  0x98   :  { %3233 = dma.done.wait [#allocation8], 256  }
  0x99   :  { %3234 = vsyncadd [#allocation8], 4294967040 }
  0x9a   :  { %3235 = dma.done.wait [#allocation10], 32  }
  0x9b   :  { %3236 = vsyncadd [#allocation10], 4294967264 }
  0x9c   :  { %3237 = dma.done.wait [#allocation13], 32  }
  0x9d   :  { %3238 = vsyncadd [#allocation13], 4294967264 }
  0x9e   :  { %3239 = dma.done.wait [#allocation16], 272  }
  0x9f   :  { %3240 = vsyncadd [#allocation16], 4294967024  ;;  %v3251_v1 = vmov 0   ;;  %s4140_s26 = sld [smem:[#allocation24_spill]]  ;;  %v3252_v25 = vmov 0.0   ;;  %v224_v39 = vlaneseq  ;;  %s3253_s28 = smov 1  }
  0xa0   :  { %2931 = vset.pattern.permute.xlu0 %v3251_v1  ;;  %2942 = vset.pattern.permute.xlu1 %v3251_v1  ;;  %vm410_vm9 = vcmask 1043456   ;;  %vm3254_vm10 = vmmov 1   ;;  %vm544_vm12 = vcmask 1041408   ;;  %s4143_s13 = sld [smem:[#allocation26_spill]]  ;;  %s3255_s0 = smov 127  }
  0xa1   :  { %v3570_v40 = vand.u32 127, %v224_v39  ;;  %vm2821_vm11 = vmpackc.low %vm410_vm9, %vm3254_vm10  ;;  %s3258_s29 = smov 32   ;;  %s4144_s3 = sld [smem:[#allocation29_spill]] }
  0xa2   :  { %vm3627_vm13 = vmpackc.low %vm544_vm12, %vm3254_vm10  ;;  %s3844_s14 = sld [smem:[#allocation5 + $0x4]]  ;;  %s3847_s5 = sld [smem:[#allocation5 + $0x5]] }
  0xa3   :  { %vm274_vm8 = vcmp.lt.s32.totalorder %v3570_v40, 5  ;;  %s3859_s11 = sld [smem:[#allocation5 + $0x6]]  ;;  %s3861_s6 = sld [smem:[#allocation5 + $0x7]] }
  0xa5   :  { %v3493_v2 = vld [vmem:[%s4140_s26] sm:$0xff]  ;;  %v3498_v3 = vld [vmem:[%s4140_s26 + $0x8] sm:$0xff]  ;;  %v3516_v9 = vld [vmem:[%s4140_s26 + $0x10] sm:$0xff] }
  0xa6   :  { %v3503_v4 = vld [vmem:[%s4140_s26 + $0x20] sm:$0xff]  ;;  %v2895_v5 = vtrunc.f32 %v3493_v2  ;;  %v2897_v6 = vtrunc.f32 %v3498_v3  ;;  %v3510_v7 = vld [vmem:[%s4140_s26 + $0x28] sm:$0xff]  ;;  %v3521_v10 = vld [vmem:[%s4140_s26 + $0x18] sm:$0xff]  ;;  %v2899_v12 = vtrunc.f32 %v3516_v9 }
  0xa7   :  { %v2903_v8 = vtrunc.f32 %v3503_v4  ;;  %v2905_v11 = vtrunc.f32 %v3510_v7  ;;  %v2901_v13 = vtrunc.f32 %v3521_v10  ;;  %v3529_v14 = vld [vmem:[%s4140_s26 + $0x30] sm:$0xff]  ;;  %v3534_v15 = vld [vmem:[%s4140_s26 + $0x38] sm:$0xff]  ;;  %s3820_s26 = sld [smem:[#allocation5 + $0x2]] }
  0xa8   :  { %v3536_v16 = vcvt.f32.s32 %v2895_v5  ;;  %v3538_v17 = vcvt.f32.s32 %v2897_v6  ;;  %v2907_v19 = vtrunc.f32 %v3529_v14  ;;  %v3545_v21 = vcvt.f32.s32 %v2899_v12  ;;  %v367_v5 = vld [vmem:[#allocation7] sm:$0xff]  ;;  %v368_v6 = vld [vmem:[#allocation7 + $0x8] sm:$0xf]  ;;  %s2542_s25 = sadd.s32 4294967295, %s3844_s14 }
  0xa9   :  { %v3540_v18 = vcvt.f32.s32 %v2903_v8  ;;  %v3543_v20 = vcvt.f32.s32 %v2905_v11  ;;  %v3547_v22 = vcvt.f32.s32 %v2901_v13  ;;  %v2909_v23 = vtrunc.f32 %v3534_v15  ;;  %v325_v12 = vld [vmem:[%s4143_s13] sm:$0xff]  ;;  %v326_v13 = vld [vmem:[%s4143_s13 + $0x8] sm:$0x3]  ;;  %s2548_s15 = sadd.s32 4294967295, %s3859_s11  ;;  %p1056_p7 = scmp.gt.s32.totalorder %s2542_s25, 0 }
  0xaa   :  { %vm200_vm0 = vcmp.eq.s32.totalorder %v3536_v16, 8  ;;  %vm201_vm1 = vcmp.eq.s32.totalorder %v3538_v17, 8  ;;  %v3553_v24 = vcvt.f32.s32 %v2907_v19  ;;  %vm202_vm4 = vcmp.eq.s32.totalorder %v3545_v21, 8  ;;  %s2551_s2 = sadd.s32 4294967295, %s3861_s6  ;;  %p1072_p9 = scmp.gt.s32.totalorder %s2548_s15, 0 }
  0xab   :  { %vm204_vm2 = vcmp.eq.s32.totalorder %v3540_v18, 8  ;;  %v2483_v26 = vsel %vm200_vm0, 1.0, %v3252_v25  ;;  %v2484_v27 = vsel %vm201_vm1, 1.0, %v3252_v25  ;;  %vm205_vm3 = vcmp.eq.s32.totalorder %v3543_v20, 8  ;;  %p1080_p10 = scmp.gt.s32.totalorder %s2551_s2, 0  ;;  %s4157_s25 = smov (!%p1056_p7, %s2542_s25), 0 }
  0xac   :  { %v2487_v28 = vsel %vm204_vm2, 1.0, %v3252_v25  ;;  %v2932_v29 = vpack.i.bf16 %v2484_v27, %v2483_v26  ;;  %v2488_v30 = vsel %vm205_vm3, 1.0, %v3252_v25  ;;  %vm203_vm5 = vcmp.eq.s32.totalorder %v3547_v22, 8  ;;  %s4161_s15 = smov (!%p1072_p9, %s2548_s15), 0  ;;  %s2543_s30 = sshll.u32 %s4157_s25, 3 }
  0xad   :  { %v2943_v31 = vpack.i.bf16 %v2488_v30, %v2487_v28  ;;  %v2485_v32 = vsel %vm202_vm4, 1.0, %v3252_v25  ;;  %v2486_v33 = vsel %vm203_vm5, 1.0, %v3252_v25  ;;  %v3564_v34 = vcvt.f32.s32 %v2909_v23  ;;  %s2536_s1 = sadd.s32 4294967295, %s3820_s26  ;;  %s4163_s2 = smov (!%p1080_p10, %s2551_s2), 0 }
  0xae   :  { %2933 = vperm.xlu0 %2931, %v2932_v29   ;;  %v2937_v35 = vpack.i.bf16 %v2486_v33, %v2485_v32  ;;  %vm206_vm6 = vcmp.eq.s32.totalorder %v3553_v24, 8  ;;  %v2820_v8 = vpack.c.bf16 %v368_v6, %v367_v5  ;;  %v3637_v19 = vpack.c.bf16 %v326_v13, %v325_v12  ;;  %p1040_p5 = scmp.gt.s32.totalorder %s2536_s1, 0  ;;  %s2549_s13 = sshll.u32 %s4161_s15, 3 }
  0xaf   :  { %2944 = vperm.xlu1 %2942, %v2943_v31   ;;  %vm207_vm7 = vcmp.eq.s32.totalorder %v3564_v34, 8  ;;  %v2489_v36 = vsel %vm206_vm6, 1.0, %v3252_v25  ;;  %vm178_vm14 = vcmp.ne.s32.totalorder %v3545_v21, 9  ;;  %vm179_vm15 = vcmp.ne.s32.totalorder %v3547_v22, 9  ;;  %s2552_s26 = sshll.u32 %s4163_s2, 3  ;;  %s1059_s23 = scalar_lea.vmem [#allocation3], %s2543_s30 }
  0xb0   :  { %v2490_v37 = vsel %vm207_vm7, 1.0, %v3252_v25  ;;  %2822 = vmatprep.subr.msk.bf16.mxu0 %vm2821_vm11, %v2820_v8  ;;  %vm176_vm0 = vcmp.ne.s32.totalorder %v3536_v16, 9  ;;  %vm177_vm1 = vcmp.ne.s32.totalorder %v3538_v17, 9  ;;  %vm182_vm2 = vcmp.ne.s32.totalorder %v3553_v24, 9  ;;  %s4153_s1 = smov (!%p1040_p5, %s2536_s1), 0  ;;  %s1083_s14 = scalar_lea.vmem [#allocation3], %s2552_s26 }
  0xb1   :  { %v2948_v38 = vpack.i.bf16 %v2490_v37, %v2489_v36  ;;  %2825 = vmatpush3.bf16.msk.msra.mxu0 %vm2821_vm11, %v2820_v8  ;;  %vm183_vm3 = vcmp.ne.s32.totalorder %v3564_v34, 9  ;;  %vm180_vm4 = vcmp.ne.s32.totalorder %v3540_v18, 9  ;;  %vm181_vm5 = vcmp.ne.s32.totalorder %v3543_v20, 9  ;;  %s4146_s11 = sld [smem:[#allocation25_spill]]  ;;  %s3260_s6 = smov 112  }
  0xb2   :  { %2938 = vperm.xlu0 %2931, %v2937_v35   ;;  %2828 = vmatprep.subr.msk.bf16.mxu0 %vm3627_vm13, %v3637_v19  ;;  %vm393_vm6 = vcmask 97280   ;;  %s4147_s25 = sld [smem:[#allocation30_spill]] }
  0xb3   :  { %2949 = vperm.xlu1 %2942, %v2948_v38  }
 0x12d   :  { %v3573_v41 = vpop.permute.xlu0 %2933 }
 0x12e   :  { %v2936_v42 = vunpack.i.h.bf16 %v3573_v41  ;;  %v2935_v43 = vunpack.i.l.bf16 %v3573_v41  ;;  %v3577_v44 = vpop.permute.xlu1 %2944 }
 0x12f   :  { %v2947_v45 = vunpack.i.h.bf16 %v3577_v44  ;;  %v2946_v46 = vunpack.i.l.bf16 %v3577_v44 }
 0x130   :  { %v318_v47 = vsel %vm274_vm8, 1.0, %v2936_v42  ;;  %v317_v48 = vsel %vm274_vm8, 1.0, %v2935_v43 }
 0x131   :  { %v322_v49 = vsel %vm274_vm8, 1.0, %v2947_v45  ;;  %v321_v50 = vsel %vm274_vm8, 1.0, %v2946_v46  ;;  %v3597_v51 = vpop.permute.xlu0 %2938  ;;  %v2953_v52 = vpack.i.bf16 %v318_v47, %v317_v48 }
 0x132   :  { %v2941_v53 = vunpack.i.h.bf16 %v3597_v51  ;;  %v2940_v54 = vunpack.i.l.bf16 %v3597_v51  ;;  %v3601_v55 = vpop.permute.xlu1 %2949  ;;  %v2963_v58 = vpack.i.bf16 %v322_v49, %v321_v50 }
 0x133   :  { %2954 = vrot.lane.b32.xlu0 %v2953_v52, %s3253_s28  ;;  %v2952_v56 = vunpack.i.h.bf16 %v3601_v55  ;;  %v2951_v57 = vunpack.i.l.bf16 %v3601_v55 }
 0x134   :  { %v320_v59 = vsel %vm274_vm8, 1.0, %v2941_v53  ;;  %v319_v60 = vsel %vm274_vm8, 1.0, %v2940_v54 }
 0x135   :  { %v324_v61 = vsel %vm274_vm8, 1.0, %v2952_v56  ;;  %v323_v62 = vsel %vm274_vm8, 1.0, %v2951_v57  ;;  %v2958_v63 = vpack.i.bf16 %v320_v59, %v319_v60  ;;  %vm519_vm8 = vcmask 80896  }
 0x136   :  { %v2968_v0 = vpack.i.bf16 %v324_v61, %v323_v62 }
 0x137   :  { %2959 = vrot.lane.b32.xlu1 %v2958_v63, %s3253_s28  ;;  %2964 = vrot.lane.b32.xlu0 %v2963_v58, %s3253_s28 }
 0x13b   :  { %2969 = vrot.lane.b32.xlu1 %v2968_v0, %s3253_s28  ;;  %227 = vperm.xlu0 %2931, %v3536_v16   ;;  %v2481_v16 = vsel %vm182_vm2, 1.0, %v3252_v25  ;;  %vm724_vm2 = vcmask 138240   ;;  %s3805_s28 = sld [smem:[#allocation5 + $0x1]] }
 0x13f   :  { %230 = vperm.xlu1 %2942, %v3538_v17   ;;  %233 = vperm.xlu0 %2931, %v3545_v21   ;;  %v2482_v17 = vsel %vm183_vm3, 1.0, %v3252_v25  ;;  %v2479_v21 = vsel %vm180_vm4, 1.0, %v3252_v25  ;;  %vm902_vm3 = vcmask 1040384   ;;  %vm3257_vm4 = vmmov 0  }
 0x140   :  { %v2988_v52 = vpack.i.bf16 %v2482_v17, %v2481_v16 }
 0x141   :  { %s2533_s16 = sadd.s32 4294967295, %s3805_s28 }
 0x142   :  { %p1032_p4 = scmp.gt.s32.totalorder %s2533_s16, 0 }
 0x143   :  { %236 = vperm.xlu1 %2942, %v3547_v22   ;;  %v2480_v22 = vsel %vm181_vm5, 1.0, %v3252_v25  ;;  %vm1087_vm5 = vcmask 1042432  }
 0x144   :  { %s4151_s16 = smov (!%p1032_p4, %s2533_s16), 0 }
 0x145   :  { %s2534_s24 = sshll.u32 %s4151_s16, 3  ;;  %s1075_s16 = scalar_lea.vmem [#allocation3], %s2549_s13 }
 0x146   :  { %s1035_s21 = scalar_lea.vmem [#allocation3], %s2534_s24 }
 0x1a5   :  { %v2955_v23 = vpop.permute.xlu0 %2954 }
 0x1a6   :  { %v2957_v26 = vunpack.i.h.bf16 %v2955_v23  ;;  %v2956_v27 = vunpack.i.l.bf16 %v2955_v23 }
 0x1a8   :  { %v360_v28 = vmul.f32 %v2957_v26, %v3498_v3  ;;  %v359_v29 = vmul.f32 %v2956_v27, %v3493_v2 }
 0x1a9   :  { %v2960_v30 = vpop.permute.xlu1 %2959  ;;  %v2965_v31 = vpop.permute.xlu0 %2964 }
 0x1aa   :  { %v2962_v32 = vunpack.i.h.bf16 %v2960_v30  ;;  %v2961_v33 = vunpack.i.l.bf16 %v2960_v30  ;;  %379 = vrot.lane.b32.xlu1 %v360_v28, %s3255_s0  ;;  %377 = vrot.lane.b32.xlu0 %v359_v29, %s3255_s0  ;;  %v2967_v35 = vunpack.i.h.bf16 %v2965_v31  ;;  %v2966_v36 = vunpack.i.l.bf16 %v2965_v31 }
 0x1ac   :  { %v362_v37 = vmul.f32 %v2962_v32, %v3521_v10  ;;  %v361_v38 = vmul.f32 %v2961_v33, %v3516_v9  ;;  %v364_v47 = vmul.f32 %v2967_v35, %v3510_v7  ;;  %v363_v3 = vmul.f32 %v2966_v36, %v3503_v4  ;;  %v2517_v32 = vld [vmem:[#allocation9] ss:$0 sm:$0xff] }
 0x1ad   :  { %v2970_v39 = vpop.permute.xlu1 %2969  ;;  %v2477_v4 = vsel %vm178_vm14, 1.0, %v3252_v25  ;;  %v2478_v7 = vsel %vm179_vm15, 1.0, %v3252_v25  ;;  %v2475_v9 = vsel %vm176_vm0, 1.0, %v3252_v25  ;;  %v2476_v10 = vsel %vm177_vm1, 1.0, %v3252_v25 }
 0x1ae   :  { %383 = vrot.lane.b32.xlu1 %v362_v37, %s3255_s0  ;;  %381 = vrot.lane.b32.xlu0 %v361_v38, %s3255_s0  ;;  %v2972_v2 = vunpack.i.h.bf16 %v2970_v39  ;;  %v2971_v48 = vunpack.i.l.bf16 %v2970_v39  ;;  %v661_v35 = vmul.f32 %v2936_v42, %v2517_v32  ;;  %v660_v37 = vmul.f32 %v2935_v43, %v2517_v32 }
 0x1af   :  { %v665_v51 = vmul.f32 %v2947_v45, %v2517_v32  ;;  %v666_v45 = vmul.f32 %v2951_v57, %v2517_v32 }
 0x1b0   :  { %v366_v49 = vmul.f32 %v2972_v2, %v3534_v15  ;;  %v365_v50 = vmul.f32 %v2971_v48, %v3529_v14  ;;  %v2978_v14 = vpack.i.bf16 %v2478_v7, %v2477_v4  ;;  %v2973_v15 = vpack.i.bf16 %v2476_v10, %v2475_v9 }
 0x1b1   :  { %v663_v48 = vmul.f32 %v2941_v53, %v2517_v32  ;;  %v662_v4 = vmul.f32 %v2940_v54, %v2517_v32 }
 0x1b2   :  { %387 = vrot.lane.b32.xlu1 %v364_v47, %s3255_s0  ;;  %385 = vrot.lane.b32.xlu0 %v363_v3, %s3255_s0 }
 0x1b6   :  { %391 = vrot.lane.b32.xlu1 %v366_v49, %s3255_s0  ;;  %389 = vrot.lane.b32.xlu0 %v365_v50, %s3255_s0 }
 0x1ba   :  { %242 = vperm.xlu1 %2942, %v3543_v20   ;;  %239 = vperm.xlu0 %2931, %v3540_v18   ;;  %v2983_v18 = vpack.i.bf16 %v2480_v22, %v2479_v21  ;;  %v228_v20 = vpop.permute.xlu0 %227 }
 0x1bb   :  { %vm250_vm7 = vcmp.eq.s32.totalorder %v228_v20, %v3570_v40 }
 0x1bc   :  { %v2491_v8 = vsel %vm250_vm7, 1.0, %v3252_v25  ;;  %vm1092_vm7 = vcmask 1045504  }
 0x1be   :  { %248 = vperm.xlu1 %2942, %v3564_v34   ;;  %245 = vperm.xlu0 %2931, %v3553_v24   ;;  %v231_v34 = vpop.permute.xlu1 %230  ;;  %v234_v58 = vpop.permute.xlu0 %233 }
 0x1bf   :  { %vm251_vm10 = vcmp.eq.s32.totalorder %v231_v34, %v3570_v40  ;;  %vm252_vm11 = vcmp.eq.s32.totalorder %v234_v58, %v3570_v40 }
 0x1c0   :  { %v2492_v11 = vsel %vm251_vm10, 1.0, %v3252_v25  ;;  %v2493_v12 = vsel %vm252_vm11, 1.0, %v3252_v25  ;;  %vm1212_vm11 = vcmask 130048  }
 0x1c2   :  { %2979 = vperm.xlu1 %2942, %v2978_v14   ;;  %2974 = vperm.xlu0 %2931, %v2973_v15   ;;  %v237_v24 = vpop.permute.xlu1 %236 }
 0x1c6   :  { %2989 = vperm.xlu1 %2942, %v2988_v52   ;;  %2984 = vperm.xlu0 %2931, %v2983_v18   ;;  %v664_v52 = vmul.f32 %v2946_v46, %v2517_v32 }
 0x21c   :  { %v380_v59 = vpop.permute.xlu1 %379  ;;  %v378_v60 = vpop.permute.xlu0 %377 }
 0x21d   :  { %2665 = vmatprep.mubr.msk.f32.mxu0 %vm393_vm6, %v378_v60  ;;  %v667_v60 = vmul.f32 %v2952_v56, %v2517_v32 }
 0x21e   :  { %2666 = vmatmul.mubr.msk.f32.vlgmr.msra.gmra.mrb[0].mxu0 %vm393_vm6, %v380_v59 }
 0x21f   :  { %2831 = vmatpush3.bf16.msk.msra.mxu0 %vm3627_vm13, %v3637_v19  ;;  %vm253_vm13 = vcmp.eq.s32.totalorder %v237_v24, %v3570_v40 }
 0x220   :  { %v384_v61 = vpop.permute.xlu1 %383  ;;  %v382_v62 = vpop.permute.xlu0 %381  ;;  %v2494_v13 = vsel %vm253_vm13, 1.0, %v3252_v25 }
 0x221   :  { %2668 = vmatprep.mubr.msk.f32.mxu0 %vm393_vm6, %v382_v62 }
 0x222   :  { %2669 = vmatmul.mubr.msk.f32.gmra.mrb[2].mxu0 %vm393_vm6, %v384_v61 }
 0x224   :  { %v388_v63 = vpop.permute.xlu1 %387  ;;  %v386_v0 = vpop.permute.xlu0 %385 }
 0x225   :  { %2671 = vmatprep.mubr.msk.f32.mxu0 %vm393_vm6, %v386_v0 }
 0x226   :  { %2672 = vmatmul.mubr.msk.f32.gmra.mrb[4].mxu0 %vm393_vm6, %v388_v63 }
 0x228   :  { %v392_v5 = vpop.permute.xlu1 %391  ;;  %v390_v6 = vpop.permute.xlu0 %389 }
 0x229   :  { %2674 = vmatprep.mubr.msk.f32.mxu0 %vm393_vm6, %v390_v6 }
 0x22a   :  { %2675 = vmatmul.mubr.msk.f32.gmra.mrb[6].mxu0 %vm393_vm6, %v392_v5  ;;  %vm1090_vm6 = vcmask 1044480  }
 0x22b   :  { %2681 = vmatprep.mubr.msk.f32.mxu0 %vm519_vm8, %v2491_v8 }
 0x22e   :  { %2682 = vmatmul.mubr.msk.f32.vlgmr.msra.gmra.mrb[0].mxu0 %vm519_vm8, %v2492_v11 }
 0x22f   :  { %2684 = vmatprep.mubr.msk.f32.mxu0 %vm519_vm8, %v2493_v12 }
 0x232   :  { %2685 = vmatmul.mubr.msk.f32.gmra.mrb[2].mxu0 %vm519_vm8, %v2494_v13 }
 0x239   :  { %v243_v19 = vpop.permute.xlu1 %242  ;;  %v240_v23 = vpop.permute.xlu0 %239 }
 0x23a   :  { %vm255_vm14 = vcmp.eq.s32.totalorder %v243_v19, %v3570_v40  ;;  %vm254_vm15 = vcmp.eq.s32.totalorder %v240_v23, %v3570_v40 }
 0x23b   :  { %v2496_v26 = vsel %vm255_vm14, 1.0, %v3252_v25  ;;  %v2495_v27 = vsel %vm254_vm15, 1.0, %v3252_v25 }
 0x23c   :  { %2687 = vmatprep.mubr.msk.f32.mxu0 %vm519_vm8, %v2495_v27 }
 0x23d   :  { %v249_v28 = vpop.permute.xlu1 %248  ;;  %2688 = vmatmul.mubr.msk.f32.gmra.mrb[4].mxu0 %vm519_vm8, %v2496_v26  ;;  %v246_v29 = vpop.permute.xlu0 %245 }
 0x23e   :  { %vm257_vm0 = vcmp.eq.s32.totalorder %v249_v28, %v3570_v40  ;;  %vm256_vm1 = vcmp.eq.s32.totalorder %v246_v29, %v3570_v40 }
 0x23f   :  { %v2498_v30 = vsel %vm257_vm0, 1.0, %v3252_v25  ;;  %v2497_v31 = vsel %vm256_vm1, 1.0, %v3252_v25 }
 0x240   :  { %2690 = vmatprep.mubr.msk.f32.mxu0 %vm519_vm8, %v2497_v31 }
 0x241   :  { %2691 = vmatmul.mubr.msk.f32.gmra.mrb[6].mxu0 %vm519_vm8, %v2498_v30  ;;  %v2975_v33 = vpop.permute.xlu0 %2974  ;;  %v2980_v2 = vpop.permute.xlu1 %2979  ;;  %vm1094_vm8 = vcmask 1046528  }
 0x242   :  { %v2977_v38 = vunpack.i.h.bf16 %v2975_v33  ;;  %v2976_v47 = vunpack.i.l.bf16 %v2975_v33  ;;  %v2981_v43 = vunpack.i.l.bf16 %v2980_v2  ;;  %v2982_v15 = vunpack.i.h.bf16 %v2980_v2  ;;  %2717 = vmatprep.mubr.msk.f32.mxu0 %vm3257_vm4, %v3252_v25 }
 0x245   :  { %v2985_v21 = vpop.permute.xlu0 %2984  ;;  %v2990_v58 = vpop.permute.xlu1 %2989 }
 0x246   :  { %v2987_v18 = vunpack.i.h.bf16 %v2985_v21  ;;  %v2986_v24 = vunpack.i.l.bf16 %v2985_v21  ;;  %v2992_v0 = vunpack.i.h.bf16 %v2990_v58  ;;  %v2991_v46 = vunpack.i.l.bf16 %v2990_v58  ;;  %v870_v58 = vld [vmem:[%s4108_s8 + $0x10] sm:$0x1] }
 0x301   :  { %v2683_v36 = vpop.f32.mrb[0].mxu0 }
 0x302   :  { %v669_v39 = vadd.f32 %v2683_v36, %v661_v35  ;;  %v614_v40 = vpop.f32.mrb[1].mxu0 }
 0x303   :  { %v668_v3 = vadd.f32 %v660_v37, %v614_v40 }
 0x304   :  { %v717_v49 = vmul.f32 %v2977_v38, %v669_v39 }
 0x305   :  { %v2686_v50 = vpop.f32.mrb[2].mxu0  ;;  %v716_v42 = vmul.f32 %v2976_v47, %v668_v3 }
 0x306   :  { %v671_v7 = vadd.f32 %v2686_v50, %v663_v48  ;;  %v624_v9 = vpop.f32.mrb[3].mxu0  ;;  %v728_v41 = vsel %vm724_vm2, %v717_v49, 0.0 }
 0x307   :  { %v670_v10 = vadd.f32 %v662_v4, %v624_v9  ;;  %729 = vadd.xlane.f32.xlu1 %v728_v41  ;;  %v725_v14 = vsel %vm724_vm2, %v716_v42, 0.0 }
 0x308   :  { %726 = vadd.xlane.f32.xlu0 %v725_v14  ;;  %v719_v17 = vmul.f32 %v2982_v15, %v671_v7 }
 0x309   :  { %v718_v16 = vmul.f32 %v2981_v43, %v670_v10 }
 0x30a   :  { %v734_v54 = vsel %vm724_vm2, %v719_v17, 0.0 }
 0x30b   :  { %v731_v53 = vsel %vm724_vm2, %v718_v16, 0.0 }
 0x30c   :  { %732 = vadd.xlane.f32.xlu0 %v731_v53 }
 0x310   :  { %v2689_v22 = vpop.f32.mrb[4].mxu0  ;;  %735 = vadd.xlane.f32.xlu0 %v734_v54 }
 0x311   :  { %v673_v20 = vadd.f32 %v2689_v22, %v665_v51  ;;  %v634_v34 = vpop.f32.mrb[5].mxu0 }
 0x312   :  { %v672_v59 = vadd.f32 %v664_v52, %v634_v34 }
 0x313   :  { %v721_v61 = vmul.f32 %v2987_v18, %v673_v20  ;;  %v868_v18 = vld [vmem:[%s4108_s8] sm:$0xff]  ;;  %v869_v20 = vld [vmem:[%s4108_s8 + $0x8] sm:$0xff] }
 0x314   :  { %v2692_v62 = vpop.f32.mrb[6].mxu0  ;;  %v720_v63 = vmul.f32 %v2986_v24, %v672_v59  ;;  %v2832_v34 = vpack.c.bf16 %v869_v20, %v868_v18  ;;  %v3256_v24 = vmov 0.0|0.0   ;;  %v1096_v59 = vld [vmem:[%s4112_s12] sm:$0xff] }
 0x315   :  { %v675_v5 = vadd.f32 %v2692_v62, %v667_v60  ;;  %v644_v6 = vpop.f32.mrb[7].mxu0  ;;  %v740_v44 = vsel %vm724_vm2, %v721_v61, 0.0  ;;  %2836 = vmatprep.subr.bf16.mxu0 %v3256_v24  ;;  %v1097_v60 = vld [vmem:[%s4112_s12 + $0x8] sm:$0xff]  ;;  %v1098_v62 = vld [vmem:[%s4112_s12 + $0x10] sm:$0x1]  ;;  %s3797_s12 = sld [smem:[#allocation5]] }
 0x316   :  { %v674_v8 = vadd.f32 %v666_v45, %v644_v6  ;;  %741 = vadd.xlane.f32.xlu0 %v740_v44  ;;  %v737_v11 = vsel %vm724_vm2, %v720_v63, 0.0  ;;  %2833 = vmatprep.subr.bf16.mxu1 %v2832_v34  ;;  %v2559_v45 = vld [vmem:[#allocation12] ss:$0 sm:$0xff] }
 0x317   :  { %738 = vadd.xlane.f32.xlu1 %v737_v11  ;;  %v723_v12 = vmul.f32 %v2992_v0, %v675_v5  ;;  %2835 = vmatpush3.bf16.msra.mxu1 %v2832_v34 }
 0x318   :  { %v722_v13 = vmul.f32 %v2991_v46, %v674_v8  ;;  %2697 = vmatprep.subr.msk.mxu1 %vm902_vm3, %v870_v58 }
 0x319   :  { %v746_v56 = vsel %vm724_vm2, %v723_v12, 0.0 }
 0x31a   :  { %747 = vadd.xlane.f32.xlu0 %v746_v56  ;;  %v743_v55 = vsel %vm724_vm2, %v722_v13, 0.0 }
 0x31b   :  { %744 = vadd.xlane.f32.xlu1 %v743_v55  ;;  %2698 = vmatpush3.msk.msra.mxu1 %vm902_vm3, %v870_v58 }
 0x31c   :  { %2839 = vmatprep.subr.bf16.mxu1 %v3256_v24 }
 0x394   :  { %v730_v57 = vpop.xlane.xlu1 %729 }
 0x395   :  { %v751_v19 = vmul.f32 0.05882353, %v730_v57  ;;  %v727_v23 = vpop.xlane.xlu0 %726 }
 0x396   :  { %v750_v26 = vmul.f32 0.05882353, %v727_v23  ;;  %v3802_v23 = vld [vmem:[%s4144_s3] ss:$0 sm:$0xff]  ;;  %s2537_s3 = sshll.u32 %s4153_s1, 3  ;;  %s3259_s1 = smov 96  }
 0x397   :  { %v3729_v27 = vsub.f32 %v717_v49, %v751_v19  ;;  %s1043_s0 = scalar_lea.vmem [#allocation3], %s2537_s3 }
 0x398   :  { %v3731_v28 = vsub.f32 %v716_v42, %v750_v26 }
 0x399   :  { %v733_v29 = vpop.xlane.xlu0 %732  ;;  %v767_v30 = vmul.f32 %v3729_v27, %v3729_v27 }
 0x39a   :  { %v752_v31 = vmul.f32 0.05882353, %v733_v29  ;;  %v766_v32 = vmul.f32 %v3731_v28, %v3731_v28 }
 0x39b   :  { %v777_v33 = vsel %vm724_vm2, %v767_v30, 0.0 }
 0x39c   :  { %v3738_v35 = vsub.f32 %v718_v16, %v752_v31  ;;  %778 = vadd.xlane.f32.xlu0 %v777_v33  ;;  %v774_v36 = vsel %vm724_vm2, %v766_v32, 0.0 }
 0x39d   :  { %775 = vadd.xlane.f32.xlu1 %v774_v36  ;;  %v736_v37 = vpop.xlane.xlu0 %735  ;;  %v3811_v36 = vld [vmem:[%s4107_s7] ss:$0 sm:$0xff]  ;;  %s3823_s7 = sld [smem:[#allocation5 + $0x3]] }
 0x39e   :  { %v753_v38 = vmul.f32 0.05882353, %v736_v37  ;;  %v768_v39 = vmul.f32 %v3738_v35, %v3738_v35  ;;  %v1208_v37 = vld [vmem:[%s4110_s10] sm:$0xff] }
 0x3a0   :  { %v3743_v40 = vsub.f32 %v719_v17, %v753_v38  ;;  %v780_v47 = vsel %vm724_vm2, %v768_v39, 0.0  ;;  %v1209_v38 = vld [vmem:[%s4110_s10 + $0x8] sm:$0xff]  ;;  %s2530_s10 = sadd.s32 4294967295, %s3797_s12  ;;  %s2545_s12 = sadd.s32 4294967295, %s3847_s5 }
 0x3a1   :  { %781 = vadd.xlane.f32.xlu1 %v780_v47  ;;  %p3836_p3 = scmp.gt.s32.totalorder %s2530_s10, 0  ;;  %p1064_p8 = scmp.gt.s32.totalorder %s2545_s12, 0 }
 0x3a2   :  { %v769_v3 = vmul.f32 %v3743_v40, %v3743_v40 }
 0x3a3   :  { %v742_v2 = vpop.xlane.xlu0 %741  ;;  %s2539_s9 = sadd.s32 4294967295, %s3823_s7  ;;  %s4149_s10 = smov (!%p3836_p3, %s2530_s10), 0 }
 0x3a4   :  { %v755_v48 = vmul.f32 0.05882353, %v742_v2  ;;  %v739_v49 = vpop.xlane.xlu1 %738  ;;  %v783_v50 = vsel %vm724_vm2, %v769_v3, 0.0  ;;  %p1048_p6 = scmp.gt.s32.totalorder %s2539_s9, 0  ;;  %s2531_s8 = sshll.u32 %s4149_s10, 3 }
 0x3a5   :  { %v754_v4 = vmul.f32 0.05882353, %v739_v49  ;;  %784 = vadd.xlane.f32.xlu0 %v783_v50  ;;  %s4159_s12 = smov (!%p1064_p8, %s2545_s12), 0  ;;  %s1027_s4 = scalar_lea.vmem [#allocation3], %s2531_s8 }
 0x3a6   :  { %v3749_v42 = vsub.f32 %v721_v61, %v755_v48  ;;  %v2837_v61 = vpack.c.bf16 %v1097_v60, %v1096_v59  ;;  %s4155_s9 = smov (!%p1048_p6, %s2539_s9), 0  ;;  %s2546_s27 = sshll.u32 %s4159_s12, 3 }
 0x3a7   :  { %v3751_v7 = vsub.f32 %v720_v63, %v754_v4  ;;  %v748_v9 = vpop.xlane.xlu0 %747  ;;  %v3826_v4 = vpack.c.bf16 %v1209_v38, %v1208_v37  ;;  %s2540_s28 = sshll.u32 %s4155_s9, 3  ;;  %s1067_s10 = scalar_lea.vmem [#allocation3], %s2546_s27 }
 0x3a8   :  { %v757_v41 = vmul.f32 0.05882353, %v748_v9  ;;  %v745_v43 = vpop.xlane.xlu1 %744  ;;  %v771_v10 = vmul.f32 %v3749_v42, %v3749_v42  ;;  %2838 = vmatpush3.bf16.msra.mxu0 %v2837_v61  ;;  %s1051_s7 = scalar_lea.vmem [#allocation3], %s2540_s28 }
 0x3a9   :  { %v756_v14 = vmul.f32 0.05882353, %v745_v43  ;;  %v770_v15 = vmul.f32 %v3751_v7, %v3751_v7  ;;  %2715 = vmatprep.subr.mxu0 %v3252_v25 }
 0x3aa   :  { %v3757_v16 = vsub.f32 %v723_v12, %v757_v41  ;;  %v789_v53 = vsel %vm724_vm2, %v771_v10, 0.0 }
 0x3ab   :  { %v3760_v17 = vsub.f32 %v722_v13, %v756_v14  ;;  %790 = vadd.xlane.f32.xlu0 %v789_v53  ;;  %v786_v21 = vsel %vm724_vm2, %v770_v15, 0.0 }
 0x3ac   :  { %787 = vadd.xlane.f32.xlu1 %v786_v21  ;;  %v773_v51 = vmul.f32 %v3757_v16, %v3757_v16  ;;  %2716 = vmatpush3.msk.msra.mxu0 %vm902_vm3, %v1098_v62 }
 0x3ad   :  { %v772_v54 = vmul.f32 %v3760_v17, %v3760_v17  ;;  %2848 = vmatprep.subr.bf16.mxu0 %v3256_v24 }
 0x3ae   :  { %v795_v22 = vsel %vm724_vm2, %v773_v51, 0.0 }
 0x3af   :  { %796 = vadd.xlane.f32.xlu0 %v795_v22  ;;  %v792_v52 = vsel %vm724_vm2, %v772_v54, 0.0 }
 0x3b0   :  { %793 = vadd.xlane.f32.xlu1 %v792_v52 }
 0x3c1   :  { %1298 = vrot.lane.b32.xlu1 %v2559_v45, %s3258_s29 }
 0x429   :  { %v779_v63 = vpop.xlane.xlu0 %778 }
 0x42a   :  { %v799_v0 = vmul.f32 0.05882353, %v779_v63  ;;  %v776_v5 = vpop.xlane.xlu1 %775 }
 0x42b   :  { %v798_v6 = vmul.f32 0.05882353, %v776_v5 }
 0x42c   :  { %v807_v44 = vadd.f32 1e-05, %v799_v0 }
 0x42d   :  { %v806_v46 = vadd.f32 1e-05, %v798_v6 }
 0x42e   :  { %2993 = vrsqrt.f32 %v807_v44  ;;  %v782_v8 = vpop.xlane.xlu1 %781 }
 0x42f   :  { %2995 = vrsqrt.f32 %v806_v46  ;;  %v800_v11 = vmul.f32 0.05882353, %v782_v8 }
 0x431   :  { %v808_v12 = vadd.f32 1e-05, %v800_v11 }
 0x432   :  { %v785_v13 = vpop.xlane.xlu0 %784 }
 0x433   :  { %2997 = vrsqrt.f32 %v808_v12  ;;  %v801_v56 = vmul.f32 0.05882353, %v785_v13 }
 0x435   :  { %v809_v55 = vadd.f32 1e-05, %v801_v56 }
 0x437   :  { %2999 = vrsqrt.f32 %v809_v55 }
 0x438   :  { %v2994_v57 = vpop.eup %2993  ;;  %v791_v19 = vpop.xlane.xlu0 %790 }
 0x439   :  { %v2996_v26 = vpop.eup %2995  ;;  %v803_v29 = vmul.f32 0.05882353, %v791_v19  ;;  %v788_v30 = vpop.xlane.xlu1 %787  ;;  %v823_v31 = vmul.f32 %v2994_v57, %v3729_v27 }
 0x43a   :  { %v802_v32 = vmul.f32 0.05882353, %v788_v30  ;;  %v822_v33 = vmul.f32 %v2996_v26, %v3731_v28  ;;  %v2520_v26 = vld [vmem:[#allocation11] ss:$0 sm:$0xff] }
 0x43b   :  { %v811_v39 = vadd.f32 1e-05, %v803_v29  ;;  %v838_v27 = vmul.f32 %v3802_v23, %v823_v31 }
 0x43c   :  { %v810_v28 = vadd.f32 1e-05, %v802_v32  ;;  %v797_v47 = vpop.xlane.xlu0 %796  ;;  %v837_v3 = vmul.f32 %v3802_v23, %v822_v33 }
 0x43d   :  { %v2998_v2 = vpop.eup %2997  ;;  %3001 = vrsqrt.f32 %v811_v39  ;;  %v805_v48 = vmul.f32 0.05882353, %v797_v47  ;;  %v794_v49 = vpop.xlane.xlu1 %793  ;;  %v853_v50 = vadd.f32 %v3811_v36, %v838_v27 }
 0x43e   :  { %3003 = vrsqrt.f32 %v810_v28  ;;  %v804_v9 = vmul.f32 0.05882353, %v794_v49  ;;  %v852_v41 = vadd.f32 %v3811_v36, %v837_v3  ;;  %v824_v43 = vmul.f32 %v2998_v2, %v3738_v35 }
 0x43f   :  { %v813_v10 = vadd.f32 1e-05, %v805_v48  ;;  %861 = vst.msk [vmem:[#allocation3 + $0x8] sm:$0xff] %vm724_vm2, %v853_v50 }
 0x440   :  { %v812_v14 = vadd.f32 1e-05, %v804_v9  ;;  %860 = vst.msk [vmem:[#allocation3] sm:$0xff] %vm724_vm2, %v852_v41  ;;  %2699 = vmatprep.mubr.msk.f32.mxu1 %vm724_vm2, %v852_v41  ;;  %v839_v15 = vmul.f32 %v3802_v23, %v824_v43 }
 0x441   :  { %v3000_v53 = vpop.eup %2999  ;;  %3005 = vrsqrt.f32 %v813_v10  ;;  %2700 = vmatmul.mubr.msk.f32.vlgmr.msra.gmra.mrb[0].mxu1 %vm724_vm2, %v853_v50  ;;  %v3930_v50 = vpop.permute.xlu1 %1298 }
 0x442   :  { %3007 = vrsqrt.f32 %v812_v14  ;;  %v854_v35 = vadd.f32 %v3811_v36, %v839_v15  ;;  %v825_v21 = vmul.f32 %v3000_v53, %v3743_v40  ;;  %2841 = vmatpush3.bf16.msra.mxu1 %v3826_v4 }
 0x443   :  { %2842 = vmatprep.subr.bf16.mxu1 %v3256_v24 }
 0x444   :  { %862 = vst.msk [vmem:[#allocation3 + $0x10] sm:$0xff] %vm724_vm2, %v854_v35  ;;  %2702 = vmatprep.mubr.msk.f32.mxu1 %vm724_vm2, %v854_v35  ;;  %v840_v51 = vmul.f32 %v3802_v23, %v825_v21 }
 0x446   :  { %v855_v40 = vadd.f32 %v3811_v36, %v840_v51 }
 0x447   :  { %v3002_v54 = vpop.eup %3001 }
 0x448   :  { %v3004_v22 = vpop.eup %3003  ;;  %863 = vst.msk [vmem:[#allocation3 + $0x18] sm:$0xff] %vm724_vm2, %v855_v40  ;;  %2703 = vmatmul.mubr.msk.f32.gmra.mrb[2].mxu1 %vm724_vm2, %v855_v40  ;;  %v827_v52 = vmul.f32 %v3002_v54, %v3749_v42  ;;  %v3941_v40 = vld [vmem:[%s4146_s11] sm:$0xff] }
 0x449   :  { %v826_v18 = vmul.f32 %v3004_v22, %v3751_v7  ;;  %vm1432_vm13 = vcmp.gt.s32.totalorder %v3941_v40, 1  ;;  %vm1543_vm15 = vcmp.gt.s32.totalorder %v3941_v40, 2  ;;  %vm1654_vm1 = vcmp.gt.s32.totalorder %v3941_v40, 3 }
 0x44a   :  { %v842_v20 = vmul.f32 %v3802_v23, %v827_v52 }
 0x44b   :  { %v3006_v34 = vpop.eup %3005  ;;  %v841_v58 = vmul.f32 %v3802_v23, %v826_v18 }
 0x44c   :  { %v3008_v59 = vpop.eup %3007  ;;  %v857_v42 = vadd.f32 %v3811_v36, %v842_v20  ;;  %v829_v60 = vmul.f32 %v3006_v34, %v3757_v16 }
 0x44d   :  { %v856_v7 = vadd.f32 %v3811_v36, %v841_v58  ;;  %v828_v61 = vmul.f32 %v3008_v59, %v3760_v17 }
 0x44e   :  { %865 = vst.msk [vmem:[#allocation3 + $0x28] sm:$0xff] %vm724_vm2, %v857_v42  ;;  %v844_v62 = vmul.f32 %v3802_v23, %v829_v60 }
 0x44f   :  { %864 = vst.msk [vmem:[#allocation3 + $0x20] sm:$0xff] %vm724_vm2, %v856_v7  ;;  %2705 = vmatprep.mubr.msk.f32.mxu1 %vm724_vm2, %v856_v7  ;;  %v843_v16 = vmul.f32 %v3802_v23, %v828_v61 }
 0x450   :  { %2706 = vmatmul.mubr.msk.f32.gmra.mrb[4].mxu1 %vm724_vm2, %v857_v42  ;;  %v859_v17 = vadd.f32 %v3811_v36, %v844_v62 }
 0x451   :  { %v858_v45 = vadd.f32 %v3811_v36, %v843_v16 }
 0x452   :  { %867 = vst.msk [vmem:[#allocation3 + $0x38] sm:$0xff] %vm724_vm2, %v859_v17 }
 0x453   :  { %866 = vst.msk [vmem:[#allocation3 + $0x30] sm:$0xff] %vm724_vm2, %v858_v45  ;;  %2708 = vmatprep.mubr.msk.f32.mxu1 %vm724_vm2, %v858_v45 }
 0x454   :  { %2709 = vmatmul.mubr.msk.f32.gmra.mrb[6].mxu1 %vm724_vm2, %v859_v17 }
 0x455   :  { %2724 = vmatprep.mubr.msk.f32.mxu1 %vm3257_vm4, %v3252_v25 }
 0x458   :  { %2725 = vmatmul.mubr.f32.vlgmr.msra.gmra.mrb[8].mxu1 %v3252_v25 }
 0x459   :  { %2844 = vmatpush3.bf16.msra.mxu1 %v3826_v4  ;;  %2731 = vmatprep.mubr.msk.f32.mxu1 %vm3257_vm4, %v3252_v25 }
 0x45a   :  { %v1028_v63 = vld [vmem:[%s1027_s4] sm:$0xff]  ;;  %2845 = vmatprep.subr.bf16.mxu1 %v3256_v24 }
 0x45b   :  { %v1036_v0 = vld [vmem:[%s1035_s21] sm:$0xff] }
 0x45c   :  { %v1044_v5 = vld [vmem:[%s1043_s0] sm:$0xff]  ;;  %v1085_v6 = vsel %vm902_vm3, %v1028_v63, %v1036_v0  ;;  %vm1765_vm3 = vcmp.gt.s32.totalorder %v3941_v40, 4 }
 0x45d   :  { %v1052_v44 = vld [vmem:[%s1051_s7] sm:$0xff]  ;;  %v1086_v46 = vsel %vm544_vm12, %v1085_v6, %v1044_v5  ;;  %vm1321_vm12 = vcmp.gt.s32.totalorder %v3941_v40, 0  ;;  %v1433_v5 = vsel %vm1432_vm13, 1, %v3251_v1  ;;  %vm2449_vm13 = vcmask 7168  }
 0x45e   :  { %v1060_v8 = vld [vmem:[%s1059_s23] sm:$0xff]  ;;  %v1088_v11 = vsel %vm1087_vm5, %v1086_v46, %v1052_v44  ;;  %v1322_v18 = vsel %vm1321_vm12, 1, %v3251_v1  ;;  %vm2098_vm12 = vcmp.gt.s32.totalorder %v3941_v40, 7 }
 0x45f   :  { %v1068_v12 = vld [vmem:[%s1067_s10] sm:$0xff]  ;;  %v1089_v13 = vsel %vm410_vm9, %v1088_v11, %v1060_v8  ;;  %vm1011_vm9 = vcmask 392192  }
 0x460   :  { %v1076_v56 = vld [vmem:[%s1075_s16] sm:$0xff]  ;;  %v1091_v55 = vsel %vm1090_vm6, %v1089_v13, %v1068_v12  ;;  %vm1876_vm6 = vcmp.gt.s32.totalorder %v3941_v40, 5 }
 0x461   :  { %v1084_v57 = vld [vmem:[%s1083_s14] sm:$0xff]  ;;  %v1093_v19 = vsel %vm1092_vm7, %v1091_v55, %v1076_v56 }
 0x462   :  { %v1095_v23 = vsel %vm1094_vm8, %v1093_v19, %v1084_v57  ;;  %vm1987_vm8 = vcmp.gt.s32.totalorder %v3941_v40, 6  ;;  %v2105_v40 = vld [vmem:[%s4147_s25] sm:$0xff] }
 0x463   :  { %2718 = vmatmul.mubr.msk.f32.vlgmr.msra.gmra.mrb[8].mxu0 %vm724_vm2, %v1095_v23 }
 0x464   :  { %2850 = vmatpush3.bf16.msra.mxu0 %v3826_v4  ;;  %2745 = vmatprep.mubr.msk.f32.mxu0 %vm3257_vm4, %v3252_v25 }
 0x465   :  { %2854 = vmatprep.subr.bf16.mxu0 %v3256_v24 }
 0x514   :  { %v2701_v29 = vpop.f32.mrb[0].mxu1 }
 0x515   :  { %v978_v30 = vadd.f32 %v2701_v29, %v2520_v26  ;;  %v972_v31 = vpop.f32.mrb[1].mxu1 }
 0x516   :  { %v973_v32 = vadd.f32 %v2520_v26, %v972_v31 }
 0x517   :  { %1013 = vst.msk [vmem:[#allocation2 + $0x8] sm:$0xff] %vm1011_vm9, %v978_v30 }
 0x518   :  { %1012 = vst.msk [vmem:[#allocation2] sm:$0xff] %vm1011_vm9, %v973_v32 }
 0x51b   :  { %v2704_v33 = vpop.f32.mrb[2].mxu1 }
 0x51c   :  { %v988_v36 = vadd.f32 %v2704_v33, %v2520_v26  ;;  %v982_v37 = vpop.f32.mrb[3].mxu1 }
 0x51d   :  { %v983_v38 = vadd.f32 %v2520_v26, %v982_v37 }
 0x51e   :  { %1015 = vst.msk [vmem:[#allocation2 + $0x18] sm:$0xff] %vm1011_vm9, %v988_v36  ;;  %v1329_v6 = vld [vmem:[#allocation2 + $0x8] sm:$0xff] }
 0x51f   :  { %1014 = vst.msk [vmem:[#allocation2 + $0x10] sm:$0xff] %vm1011_vm9, %v983_v38  ;;  %v1211_v15 = vld [vmem:[#allocation2] sm:$0xff] }
 0x523   :  { %v2707_v39 = vpop.f32.mrb[4].mxu1 }
 0x524   :  { %v998_v27 = vadd.f32 %v2707_v39, %v2520_v26  ;;  %v992_v28 = vpop.f32.mrb[5].mxu1 }
 0x525   :  { %v993_v47 = vadd.f32 %v2520_v26, %v992_v28 }
 0x526   :  { %1017 = vst.msk [vmem:[#allocation2 + $0x28] sm:$0xff] %vm1011_vm9, %v998_v27  ;;  %v1544_v27 = vsel %vm1543_vm15, 1, %v3251_v1  ;;  %v1440_v28 = vld [vmem:[#allocation2 + $0x10] sm:$0xff] }
 0x527   :  { %1016 = vst.msk [vmem:[#allocation2 + $0x20] sm:$0xff] %vm1011_vm9, %v993_v47  ;;  %v2710_v3 = vpop.f32.mrb[6].mxu1 }
 0x528   :  { %v1008_v2 = vadd.f32 %v2710_v3, %v2520_v26  ;;  %v1002_v48 = vpop.f32.mrb[7].mxu1 }
 0x529   :  { %v1003_v49 = vadd.f32 %v2520_v26, %v1002_v48 }
 0x52a   :  { %1019 = vst.msk [vmem:[#allocation2 + $0x38] sm:$0xff] %vm1011_vm9, %v1008_v2 }
 0x52b   :  { %1018 = vst.msk [vmem:[#allocation2 + $0x30] sm:$0xff] %vm1011_vm9, %v1003_v49  ;;  %v1282_v9 = vpop.f32.mrb[8].mxu1 }
 0x52c   :  { %v1301_v41 = vadd.f32 %v3930_v50, %v1282_v9  ;;  %v2726_v43 = vpop.f32.mrb[9].mxu1  ;;  %v1286_v53 = vadd.f32 %v1282_v9, %v1211_v15 }
 0x52e   :  { %1303 = vrot.lane.b32.xlu0 %v1301_v41, %s3259_s1  ;;  %v2558_v35 = vmul.f32 -1.442695, %v1286_v53 }
 0x530   :  { %3009 = vpow2.f32 %v2558_v35 }
 0x536   :  { %v3936_v10 = vpop.f32.mrb[8].mxu0 }
 0x537   :  { %v2719_v14 = vpop.f32.mrb[9].mxu0 }
 0x53a   :  { %v3010_v21 = vpop.eup %3009 }
 0x53b   :  { %v1290_v51 = vadd.f32 1.0, %v3010_v21 }
 0x53d   :  { %3011 = vrcp.f32 %v1290_v51 }
 0x547   :  { %v3012_v54 = vpop.eup %3011 }
 0x548   :  { %v1313_v59 = vsub.f32 1.0, %v3012_v54  ;;  %v1319_v7 = vmul.f32 0.0, %v3012_v54 }
 0x5a0   :  { %v1304_v22 = vpop.permute.xlu0 %1303 }
 0x5a1   :  { %v1306_v52 = vmul.f32 %v3012_v54, %v1304_v22 }
 0x5a3   :  { %1308 = vrot.lane.b32.xlu1 %v1306_v52, %s3258_s29 }
 0x5a7   :  { %1324 = vperm.xlu1 %2942, %v1322_v18  }
 0x615   :  { %v1309_v20 = vpop.permute.xlu1 %1308 }
 0x616   :  { %v1311_v34 = vadd.f32 %v1309_v20, %v1211_v15 }
 0x618   :  { %3013 = vtanh.f32 %v1311_v34 }
 0x622   :  { %v3014_v58 = vpop.eup %3013 }
 0x623   :  { %1315 = vrot.lane.b32.xlu0 %v3014_v58, %s3260_s6 }
 0x626   :  { %v1325_v60 = vpop.permute.xlu1 %1324 }
 0x627   :  { %vm1326_vm10 = vcmp.eq.s32.totalorder %v1325_v60, 1 }
 0x695   :  { %v1316_v42 = vpop.permute.xlu0 %1315 }
 0x696   :  { %v1318_v61 = vmul.f32 %v1316_v42, %v1313_v59  ;;  %v1655_v59 = vsel %vm1654_vm1, 1, %v3251_v1  ;;  %v1551_v42 = vld [vmem:[#allocation2 + $0x18] sm:$0xff] }
 0x698   :  { %v1320_v62 = vadd.f32 %v1319_v7, %v1318_v61 }
 0x69a   :  { %v1327_v16 = vsel %vm1326_vm10, %v1320_v62, 0.0 }
 0x69b   :  { %1331 = vrot.lane.b32.xlu1 %v1327_v16, %s3260_s6 }
 0x70d   :  { %v1332_v17 = vpop.permute.xlu1 %1331 }
 0x70e   :  { %2732 = vmatmul.mubr.msk.f32.vlgmr.msra.gmra.mrb[10].mxu1 %vm1212_vm11, %v1332_v17 }
 0x70f   :  { %2847 = vmatpush3.bf16.msra.mxu1 %v3826_v4  ;;  %2738 = vmatprep.mubr.msk.f32.mxu1 %vm3257_vm4, %v3252_v25 }
 0x710   :  { %2851 = vmatprep.subr.bf16.mxu1 %v3256_v24 }
 0x7e1   :  { %v1401_v45 = vpop.f32.mrb[10].mxu1 }
 0x7e2   :  { %v1412_v63 = vadd.f32 %v1401_v45, %v3930_v50  ;;  %v2733_v0 = vpop.f32.mrb[11].mxu1  ;;  %v1405_v44 = vadd.f32 %v1401_v45, %v1329_v6 }
 0x7e4   :  { %1414 = vrot.lane.b32.xlu0 %v1412_v63, %s3259_s1  ;;  %v2561_v46 = vmul.f32 -1.442695, %v1405_v44 }
 0x7e6   :  { %3015 = vpow2.f32 %v2561_v46 }
 0x7e8   :  { %1435 = vperm.xlu0 %2931, %v1433_v5  }
 0x7f0   :  { %v3016_v8 = vpop.eup %3015 }
 0x7f1   :  { %v1409_v11 = vadd.f32 1.0, %v3016_v8 }
 0x7f3   :  { %3017 = vrcp.f32 %v1409_v11 }
 0x7fd   :  { %v3018_v12 = vpop.eup %3017 }
 0x7fe   :  { %v1424_v23 = vsub.f32 1.0, %v3018_v12  ;;  %v1430_v30 = vmul.f32 %v3018_v12, %v1327_v16 }
 0x856   :  { %v1415_v13 = vpop.permute.xlu0 %1414 }
 0x857   :  { %v1417_v56 = vmul.f32 %v3018_v12, %v1415_v13 }
 0x859   :  { %1419 = vrot.lane.b32.xlu1 %v1417_v56, %s3258_s29 }
 0x867   :  { %v1436_v29 = vpop.permute.xlu0 %1435 }
 0x868   :  { %vm1437_vm14 = vcmp.eq.s32.totalorder %v1436_v29, 1 }
 0x8cb   :  { %v1420_v55 = vpop.permute.xlu1 %1419 }
 0x8cc   :  { %v1422_v57 = vadd.f32 %v1420_v55, %v1329_v6 }
 0x8ce   :  { %3019 = vtanh.f32 %v1422_v57 }
 0x8d8   :  { %v3020_v19 = vpop.eup %3019 }
 0x8d9   :  { %1426 = vrot.lane.b32.xlu1 %v3020_v19, %s3260_s6 }
 0x94b   :  { %v1427_v26 = vpop.permute.xlu1 %1426 }
 0x94c   :  { %v1429_v31 = vmul.f32 %v1427_v26, %v1424_v23  ;;  %v1766_v23 = vsel %vm1765_vm3, 1, %v3251_v1  ;;  %v1662_v26 = vld [vmem:[#allocation2 + $0x20] sm:$0xff] }
 0x94e   :  { %v1431_v32 = vadd.f32 %v1430_v30, %v1429_v31 }
 0x950   :  { %v1438_v33 = vsel %vm1437_vm14, %v1431_v32, %v1327_v16 }
 0x951   :  { %1442 = vrot.lane.b32.xlu0 %v1438_v33, %s3260_s6 }
 0x9c3   :  { %v1443_v36 = vpop.permute.xlu0 %1442 }
 0x9c4   :  { %2739 = vmatmul.mubr.msk.f32.vlgmr.msra.gmra.mrb[12].mxu1 %vm1212_vm11, %v1443_v36 }
 0x9c5   :  { %2853 = vmatpush3.bf16.msra.mxu1 %v3826_v4  ;;  %2752 = vmatprep.mubr.msk.f32.mxu1 %vm3257_vm4, %v3252_v25 }
 0x9c6   :  { %2857 = vmatprep.subr.bf16.mxu1 %v3256_v24 }
 0xa97   :  { %v1512_v37 = vpop.f32.mrb[12].mxu1 }
 0xa98   :  { %v1523_v38 = vadd.f32 %v1512_v37, %v3930_v50  ;;  %v2740_v39 = vpop.f32.mrb[13].mxu1  ;;  %v1516_v47 = vadd.f32 %v1512_v37, %v1440_v28 }
 0xa9a   :  { %1525 = vrot.lane.b32.xlu1 %v1523_v38, %s3259_s1  ;;  %v2563_v3 = vmul.f32 -1.442695, %v1516_v47 }
 0xa9c   :  { %3021 = vpow2.f32 %v2563_v3 }
 0xa9e   :  { %1546 = vperm.xlu1 %2942, %v1544_v27  }
 0xaa6   :  { %v3022_v2 = vpop.eup %3021 }
 0xaa7   :  { %v1520_v48 = vadd.f32 1.0, %v3022_v2 }
 0xaa9   :  { %3023 = vrcp.f32 %v1520_v48 }
 0xab3   :  { %v3024_v49 = vpop.eup %3023 }
 0xab4   :  { %v1535_v53 = vsub.f32 1.0, %v3024_v49  ;;  %v1541_v51 = vmul.f32 %v3024_v49, %v1438_v33 }
 0xb0c   :  { %v1526_v9 = vpop.permute.xlu1 %1525 }
 0xb0d   :  { %v1528_v41 = vmul.f32 %v3024_v49, %v1526_v9 }
 0xb0f   :  { %1530 = vrot.lane.b32.xlu0 %v1528_v41, %s3258_s29 }
 0xb1d   :  { %v1547_v21 = vpop.permute.xlu1 %1546 }
 0xb1e   :  { %vm1548_vm0 = vcmp.eq.s32.totalorder %v1547_v21, 1 }
 0xb81   :  { %v1531_v43 = vpop.permute.xlu0 %1530 }
 0xb82   :  { %v1533_v14 = vadd.f32 %v1531_v43, %v1440_v28 }
 0xb84   :  { %3025 = vtanh.f32 %v1533_v14 }
 0xb8e   :  { %v3026_v15 = vpop.eup %3025 }
 0xb8f   :  { %1537 = vrot.lane.b32.xlu0 %v3026_v15, %s3260_s6 }
 0xc01   :  { %v1538_v35 = vpop.permute.xlu0 %1537 }
 0xc02   :  { %v1540_v54 = vmul.f32 %v1538_v35, %v1535_v53  ;;  %v1877_v53 = vsel %vm1876_vm6, 1, %v3251_v1  ;;  %v1773_v35 = vld [vmem:[#allocation2 + $0x28] sm:$0xff] }
 0xc04   :  { %v1542_v22 = vadd.f32 %v1541_v51, %v1540_v54 }
 0xc06   :  { %v1549_v52 = vsel %vm1548_vm0, %v1542_v22, %v1438_v33 }
 0xc07   :  { %1553 = vrot.lane.b32.xlu1 %v1549_v52, %s3260_s6 }
 0xc79   :  { %v1554_v18 = vpop.permute.xlu1 %1553 }
 0xc7a   :  { %2746 = vmatmul.mubr.msk.f32.vlgmr.msra.gmra.mrb[10].mxu0 %vm1212_vm11, %v1554_v18 }
 0xc7b   :  { %2856 = vmatpush3.bf16.msra.mxu0 %v3826_v4  ;;  %2759 = vmatprep.mubr.msk.f32.mxu0 %vm3257_vm4, %v3252_v25 }
 0xc7c   :  { %2860 = vmatprep.subr.bf16.mxu0 %v3256_v24 }
 0xd4d   :  { %v1623_v20 = vpop.f32.mrb[10].mxu0 }
 0xd4e   :  { %v1634_v34 = vadd.f32 %v1623_v20, %v3930_v50  ;;  %v2747_v58 = vpop.f32.mrb[11].mxu0  ;;  %v1627_v60 = vadd.f32 %v1623_v20, %v1551_v42 }
 0xd50   :  { %1636 = vrot.lane.b32.xlu0 %v1634_v34, %s3259_s1  ;;  %v2565_v7 = vmul.f32 -1.442695, %v1627_v60 }
 0xd52   :  { %3027 = vpow2.f32 %v2565_v7 }
 0xd54   :  { %1657 = vperm.xlu0 %2931, %v1655_v59  }
 0xd5c   :  { %v3028_v61 = vpop.eup %3027 }
 0xd5d   :  { %v1631_v62 = vadd.f32 1.0, %v3028_v61 }
 0xd5f   :  { %3029 = vrcp.f32 %v1631_v62 }
 0xd69   :  { %v3030_v16 = vpop.eup %3029 }
 0xd6a   :  { %v1646_v6 = vsub.f32 1.0, %v3030_v16  ;;  %v1652_v8 = vmul.f32 %v3030_v16, %v1549_v52 }
 0xdc2   :  { %v1637_v17 = vpop.permute.xlu0 %1636 }
 0xdc3   :  { %v1639_v45 = vmul.f32 %v3030_v16, %v1637_v17 }
 0xdc5   :  { %1641 = vrot.lane.b32.xlu1 %v1639_v45, %s3258_s29 }
 0xdd3   :  { %v1658_v46 = vpop.permute.xlu0 %1657 }
 0xdd4   :  { %vm1659_vm2 = vcmp.eq.s32.totalorder %v1658_v46, 1 }
 0xe37   :  { %v1642_v63 = vpop.permute.xlu1 %1641 }
 0xe38   :  { %v1644_v0 = vadd.f32 %v1642_v63, %v1551_v42 }
 0xe3a   :  { %3031 = vtanh.f32 %v1644_v0 }
 0xe44   :  { %v3032_v5 = vpop.eup %3031 }
 0xe45   :  { %1648 = vrot.lane.b32.xlu1 %v3032_v5, %s3260_s6  ;;  %v1988_v5 = vsel %vm1987_vm8, 1, %v3251_v1 }
 0xeb7   :  { %v1649_v44 = vpop.permute.xlu1 %1648 }
 0xeb8   :  { %v1651_v11 = vmul.f32 %v1649_v44, %v1646_v6  ;;  %v1884_v6 = vld [vmem:[#allocation2 + $0x30] sm:$0xff] }
 0xeba   :  { %v1653_v12 = vadd.f32 %v1652_v8, %v1651_v11 }
 0xebc   :  { %v1660_v13 = vsel %vm1659_vm2, %v1653_v12, %v1549_v52 }
 0xebd   :  { %1664 = vrot.lane.b32.xlu0 %v1660_v13, %s3260_s6 }
 0xf2f   :  { %v1665_v56 = vpop.permute.xlu0 %1664 }
 0xf30   :  { %2753 = vmatmul.mubr.msk.f32.vlgmr.msra.gmra.mrb[14].mxu1 %vm1212_vm11, %v1665_v56 }
 0xf31   :  { %2859 = vmatpush3.bf16.msra.mxu1 %v3826_v4  ;;  %2766 = vmatprep.mubr.msk.f32.mxu1 %vm3257_vm4, %v3252_v25 }
 0xf32   :  { %2863 = vmatprep.subr.bf16.mxu1 %v3256_v24 }
0x1003   :  { %v1734_v55 = vpop.f32.mrb[14].mxu1 }
0x1004   :  { %v1745_v57 = vadd.f32 %v1734_v55, %v3930_v50  ;;  %v2754_v19 = vpop.f32.mrb[15].mxu1  ;;  %v1738_v29 = vadd.f32 %v1734_v55, %v1662_v26 }
0x1006   :  { %1747 = vrot.lane.b32.xlu1 %v1745_v57, %s3259_s1  ;;  %v2567_v30 = vmul.f32 -1.442695, %v1738_v29 }
0x1008   :  { %3033 = vpow2.f32 %v2567_v30 }
0x100a   :  { %1768 = vperm.xlu1 %2942, %v1766_v23  }
0x1012   :  { %v3034_v31 = vpop.eup %3033 }
0x1013   :  { %v1742_v32 = vadd.f32 1.0, %v3034_v31 }
0x1015   :  { %3035 = vrcp.f32 %v1742_v32 }
0x101f   :  { %v3036_v33 = vpop.eup %3035 }
0x1020   :  { %v1757_v28 = vsub.f32 1.0, %v3036_v33  ;;  %v1763_v2 = vmul.f32 %v3036_v33, %v1660_v13 }
0x1078   :  { %v1748_v36 = vpop.permute.xlu1 %1747 }
0x1079   :  { %v1750_v37 = vmul.f32 %v3036_v33, %v1748_v36 }
0x107b   :  { %1752 = vrot.lane.b32.xlu0 %v1750_v37, %s3258_s29  ;;  %v2553_v37 = vld [vmem:[#allocation14] ss:$0 sm:$0xff] }
0x1089   :  { %v1769_v3 = vpop.permute.xlu1 %1768 }
0x108a   :  { %vm1770_vm5 = vcmp.eq.s32.totalorder %v1769_v3, 1 }
0x10ed   :  { %v1753_v38 = vpop.permute.xlu0 %1752 }
0x10ee   :  { %v1755_v39 = vadd.f32 %v1753_v38, %v1662_v26  ;;  %v1179_v38 = vadd.f32 %v2553_v37, %v3936_v10 }
0x10f0   :  { %3037 = vtanh.f32 %v1755_v39  ;;  %v2556_v39 = vmul.f32 -1.442695, %v1179_v38 }
0x10fa   :  { %v3038_v27 = vpop.eup %3037 }
0x10fb   :  { %1759 = vrot.lane.b32.xlu0 %v3038_v27, %s3260_s6 }
0x116d   :  { %v1760_v47 = vpop.permute.xlu0 %1759 }
0x116e   :  { %v1762_v48 = vmul.f32 %v1760_v47, %v1757_v28 }
0x1170   :  { %v1764_v49 = vadd.f32 %v1763_v2, %v1762_v48 }
0x1172   :  { %v1771_v9 = vsel %vm1770_vm5, %v1764_v49, %v1660_v13  ;;  %v2557_v49 = vld [vmem:[#allocation15] ss:$0 sm:$0xff] }
0x1173   :  { %1775 = vrot.lane.b32.xlu1 %v1771_v9, %s3260_s6 }
0x11e5   :  { %v1776_v41 = vpop.permute.xlu1 %1775 }
0x11e6   :  { %2760 = vmatmul.mubr.msk.f32.vlgmr.msra.gmra.mrb[12].mxu0 %vm1212_vm11, %v1776_v41  ;;  %v1995_v41 = vld [vmem:[#allocation2 + $0x38] sm:$0xff] }
0x11e7   :  { %2862 = vmatpush3.bf16.msra.mxu0 %v3826_v4  ;;  %2773 = vmatprep.mubr.msk.f32.mxu0 %vm3257_vm4, %v3252_v25 }
0x11e8   :  { %2866 = vmatprep.subr.bf16.mxu0 %v3256_v24 }
0x12b9   :  { %v1845_v43 = vpop.f32.mrb[12].mxu0 }
0x12ba   :  { %v1856_v14 = vadd.f32 %v1845_v43, %v3930_v50  ;;  %v2761_v15 = vpop.f32.mrb[13].mxu0  ;;  %v1849_v21 = vadd.f32 %v1845_v43, %v1773_v35 }
0x12bc   :  { %1858 = vrot.lane.b32.xlu0 %v1856_v14, %s3259_s1  ;;  %v2569_v51 = vmul.f32 -1.442695, %v1849_v21 }
0x12be   :  { %3039 = vpow2.f32 %v2569_v51  ;;  %v2099_v51 = vsel %vm2098_vm12, 1, %v3251_v1  ;;  %v2106_v1 = vld [vmem:[%s4147_s25 + $0x8] sm:$0xff] }
0x12c0   :  { %1879 = vperm.xlu0 %2931, %v1877_v53  }
0x12c8   :  { %v3040_v4 = vpop.eup %3039 }
0x12c9   :  { %v1853_v54 = vadd.f32 1.0, %v3040_v4 }
0x12cb   :  { %3041 = vrcp.f32 %v1853_v54 }
0x12d5   :  { %v3042_v22 = vpop.eup %3041 }
0x12d6   :  { %v1868_v59 = vsub.f32 1.0, %v3042_v22  ;;  %v1874_v7 = vmul.f32 %v3042_v22, %v1771_v9 }
0x132e   :  { %v1859_v52 = vpop.permute.xlu0 %1858 }
0x132f   :  { %v1861_v18 = vmul.f32 %v3042_v22, %v1859_v52 }
0x1331   :  { %1863 = vrot.lane.b32.xlu1 %v1861_v18, %s3258_s29  ;;  %v2107_v18 = vld [vmem:[#allocation17] sm:$0xff] }
0x133f   :  { %v1880_v60 = vpop.permute.xlu0 %1879 }
0x1340   :  { %vm1881_vm7 = vcmp.eq.s32.totalorder %v1880_v60, 1 }
0x13a3   :  { %v1864_v20 = vpop.permute.xlu1 %1863 }
0x13a4   :  { %v1866_v34 = vadd.f32 %v1864_v20, %v1773_v35  ;;  %v2108_v20 = vld [vmem:[#allocation17 + $0x8] sm:$0xff] }
0x13a6   :  { %3043 = vtanh.f32 %v1866_v34  ;;  %v2864_v34 = vpack.c.bf16 %v2108_v20, %v2107_v18 }
0x13b0   :  { %v3044_v58 = vpop.eup %3043 }
0x13b1   :  { %1870 = vrot.lane.b32.xlu1 %v3044_v58, %s3260_s6  ;;  %v2867_v58 = vpack.c.bf16 %v2106_v1, %v2105_v40 }
0x1423   :  { %v1871_v42 = vpop.permute.xlu1 %1870 }
0x1424   :  { %v1873_v61 = vmul.f32 %v1871_v42, %v1868_v59 }
0x1426   :  { %v1875_v62 = vadd.f32 %v1874_v7, %v1873_v61 }
0x1428   :  { %v1882_v16 = vsel %vm1881_vm7, %v1875_v62, %v1771_v9 }
0x1429   :  { %1886 = vrot.lane.b32.xlu0 %v1882_v16, %s3260_s6 }
0x149b   :  { %v1887_v17 = vpop.permute.xlu0 %1886 }
0x149c   :  { %2767 = vmatmul.mubr.msk.f32.vlgmr.msra.gmra.mrb[16].mxu1 %vm1212_vm11, %v1887_v17 }
0x149d   :  { %2780 = vmatprep.mubr.msk.f32.mxu1 %vm3257_vm4, %v3252_v25  ;;  %2865 = vmatpush3.bf16.msra.mxu1 %v2864_v34 }
0x149e   :  { %2869 = vmatprep.subr.bf16.mxu1 %v3256_v24 }
0x156f   :  { %v1956_v45 = vpop.f32.mrb[16].mxu1 }
0x1570   :  { %v1967_v63 = vadd.f32 %v1956_v45, %v3930_v50  ;;  %v2768_v0 = vpop.f32.mrb[17].mxu1  ;;  %v1960_v44 = vadd.f32 %v1956_v45, %v1884_v6 }
0x1572   :  { %1969 = vrot.lane.b32.xlu1 %v1967_v63, %s3259_s1  ;;  %v2571_v46 = vmul.f32 -1.442695, %v1960_v44  ;;  %v2269_v44 = vld [vmem:[%s4118_s18 + $0x8] sm:$0xff] }
0x1574   :  { %3045 = vpow2.f32 %v2571_v46  ;;  %v2270_v46 = vld [vmem:[%s4118_s18 + $0x10] sm:$0xff] }
0x1576   :  { %1990 = vperm.xlu1 %2942, %v1988_v5  }
0x157e   :  { %v3046_v8 = vpop.eup %3045 }
0x157f   :  { %v1964_v11 = vadd.f32 1.0, %v3046_v8 }
0x1581   :  { %3047 = vrcp.f32 %v1964_v11  ;;  %v2271_v11 = vld [vmem:[%s4118_s18 + $0x18] sm:$0xff] }
0x158b   :  { %v3048_v12 = vpop.eup %3047 }
0x158c   :  { %v1979_v23 = vsub.f32 1.0, %v3048_v12  ;;  %v1985_v30 = vmul.f32 %v3048_v12, %v1882_v16 }
0x15e4   :  { %v1970_v13 = vpop.permute.xlu1 %1969 }
0x15e5   :  { %v1972_v56 = vmul.f32 %v3048_v12, %v1970_v13  ;;  %v2873_v12 = vpack.c.bf16 %v2271_v11, %v2270_v46 }
0x15e7   :  { %1974 = vrot.lane.b32.xlu0 %v1972_v56, %s3258_s29  ;;  %v2272_v56 = vld [vmem:[%s4118_s18 + $0x20] sm:$0xff] }
0x15f5   :  { %v1991_v29 = vpop.permute.xlu1 %1990 }
0x15f6   :  { %vm1992_vm9 = vcmp.eq.s32.totalorder %v1991_v29, 1  ;;  %v2359_v29 = vld [vmem:[%s4120_s20 + $0x8] sm:$0xff] }
0x1659   :  { %v1975_v55 = vpop.permute.xlu0 %1974 }
0x165a   :  { %v1977_v57 = vadd.f32 %v1975_v55, %v1884_v6  ;;  %v2268_v6 = vld [vmem:[%s4118_s18] sm:$0xff]  ;;  %v2273_v55 = vld [vmem:[%s4118_s18 + $0x28] sm:$0xff] }
0x165b   :  { %v2870_v8 = vpack.c.bf16 %v2269_v44, %v2268_v6 }
0x165c   :  { %3049 = vtanh.f32 %v1977_v57  ;;  %v2876_v57 = vpack.c.bf16 %v2273_v55, %v2272_v56 }
0x165d   :  { %3051 = vpow2.f32 %v2556_v39 }
0x1666   :  { %v3050_v19 = vpop.eup %3049 }
0x1667   :  { %1981 = vrot.lane.b32.xlu0 %v3050_v19, %s3260_s6  ;;  %v3052_v27 = vpop.eup %3051  ;;  %v2274_v19 = vld [vmem:[%s4118_s18 + $0x30] sm:$0xff] }
0x1668   :  { %v1185_v28 = vadd.f32 1.0, %v3052_v27 }
0x166a   :  { %3053 = vrcp.f32 %v1185_v28  ;;  %v2360_v28 = vld [vmem:[%s4120_s20 + $0x10] sm:$0xff] }
0x1674   :  { %v3054_v48 = vpop.eup %3053 }
0x1675   :  { %v1195_v9 = vmul.f32 %v3054_v48, %v2557_v49  ;;  %v1202_v60 = vsub.f32 1.0, %v3054_v48 }
0x16d9   :  { %v1982_v26 = vpop.permute.xlu0 %1981 }
0x16da   :  { %v1984_v31 = vmul.f32 %v1982_v26, %v1979_v23  ;;  %v2358_v26 = vld [vmem:[%s4120_s20] sm:$0xff] }
0x16dc   :  { %v1986_v32 = vadd.f32 %v1985_v30, %v1984_v31  ;;  %v2882_v30 = vpack.c.bf16 %v2359_v29, %v2358_v26 }
0x16de   :  { %v4017_v33 = vsel %vm1992_vm9, %v1986_v32, %v1882_v16 }
0x16df   :  { %1997 = vrot.lane.b32.xlu1 %v4017_v33, %s3260_s6 }
0x1751   :  { %v1998_v36 = vpop.permute.xlu1 %1997 }
0x1752   :  { %2774 = vmatmul.mubr.msk.f32.vlgmr.msra.gmra.mrb[14].mxu0 %vm1212_vm11, %v1998_v36  ;;  %v2576_v36 = vld [vmem:[%s4117_s17] ss:$0 sm:$0xff] }
0x1753   :  { %2787 = vmatprep.mubr.msk.f32.mxu0 %vm3257_vm4, %v3252_v25  ;;  %2868 = vmatpush3.bf16.msra.mxu0 %v2867_v58 }
0x1754   :  { %2881 = vmatprep.subr.bf16.mxu0 %v3256_v24 }
0x1825   :  { %v2067_v47 = vpop.f32.mrb[14].mxu0 }
0x1826   :  { %v2078_v3 = vadd.f32 %v2067_v47, %v3930_v50  ;;  %v2775_v2 = vpop.f32.mrb[15].mxu0  ;;  %v2071_v43 = vadd.f32 %v2067_v47, %v1995_v41 }
0x1828   :  { %2080 = vrot.lane.b32.xlu0 %v2078_v3, %s3259_s1  ;;  %v2573_v14 = vmul.f32 -1.442695, %v2071_v43  ;;  %v2577_v3 = vld [vmem:[%s4119_s19] ss:$0 sm:$0xff] }
0x182a   :  { %3055 = vpow2.f32 %v2573_v14 }
0x182c   :  { %1197 = vrot.lane.b32.xlu0 %v1195_v9, %s3258_s29 }
0x1834   :  { %v3056_v10 = vpop.eup %3055 }
0x1835   :  { %v2075_v15 = vadd.f32 1.0, %v3056_v10 }
0x1837   :  { %3057 = vrcp.f32 %v2075_v15 }
0x1841   :  { %v3058_v53 = vpop.eup %3057 }
0x1842   :  { %v2090_v62 = vsub.f32 1.0, %v3058_v53  ;;  %v2096_v17 = vmul.f32 %v3058_v53, %v4017_v33 }
0x189a   :  { %v2081_v35 = vpop.permute.xlu0 %2080 }
0x189b   :  { %v2083_v21 = vmul.f32 %v3058_v53, %v2081_v35 }
0x189d   :  { %2085 = vrot.lane.b32.xlu1 %v2083_v21, %s3258_s29 }
0x189e   :  { %v1198_v50 = vpop.permute.xlu0 %1197 }
0x189f   :  { %v1200_v4 = vadd.f32 %v1198_v50, %v1179_v38 }
0x18a1   :  { %3059 = vtanh.f32 %v1200_v4  ;;  %2101 = vperm.xlu1 %2942, %v2099_v51  }
0x18ab   :  { %v3060_v54 = vpop.eup %3059 }
0x18ac   :  { %1204 = vrot.lane.b32.xlu1 %v3060_v54, %s3260_s6 }
0x190f   :  { %v2086_v22 = vpop.permute.xlu1 %2085 }
0x1910   :  { %v2088_v52 = vadd.f32 %v2086_v22, %v1995_v41  ;;  %v2579_v41 = vld [vmem:[#allocation6] ss:$0 sm:$0xff] }
0x1912   :  { %3061 = vtanh.f32 %v2088_v52 }
0x191c   :  { %v3062_v59 = vpop.eup %3061 }
0x191d   :  { %2092 = vrot.lane.b32.xlu0 %v3062_v59, %s3260_s6 }
0x1920   :  { %v2102_v42 = vpop.permute.xlu1 %2101 }
0x1921   :  { %vm2103_vm10 = vcmp.eq.s32.totalorder %v2102_v42, 1 }
0x1924   :  { %v1205_v7 = vpop.permute.xlu1 %1204 }
0x1925   :  { %v1207_v61 = vmul.f32 %v1205_v7, %v1202_v60 }
0x1927   :  { %2110 = vrot.lane.b32.xlu0 %v1207_v61, %s3260_s6 }
0x198f   :  { %v2093_v16 = vpop.permute.xlu0 %2092 }
0x1990   :  { %v2095_v45 = vmul.f32 %v2093_v16, %v2090_v62 }
0x1992   :  { %v2097_v63 = vadd.f32 %v2096_v17, %v2095_v45 }
0x1994   :  { %v2104_v0 = vsel %vm2103_vm10, %v2097_v63, %v4017_v33 }
0x1995   :  { %2185 = vrot.lane.b32.xlu1 %v2104_v0, %s3260_s6 }
0x1999   :  { %v2111_v5 = vpop.permute.xlu0 %2110 }
0x199a   :  { %2781 = vmatmul.mubr.msk.f32.vlgmr.msra.gmra.mrb[18].mxu1 %vm1212_vm11, %v2111_v5 }
0x199b   :  { %2806 = vmatprep.mubr.msk.f32.mxu1 %vm3257_vm4, %v3252_v25  ;;  %2871 = vmatpush3.bf16.msra.mxu1 %v2870_v8 }
0x199c   :  { %2872 = vmatprep.subr.bf16.mxu1 %v3256_v24 }
0x199f   :  { %2874 = vmatpush3.bf16.msra.mxu1 %v2873_v12 }
0x19a0   :  { %2875 = vmatprep.subr.bf16.mxu1 %v3256_v24 }
0x19a3   :  { %2877 = vmatpush3.bf16.msra.mxu1 %v2876_v57 }
0x19a4   :  { %2878 = vmatprep.subr.bf16.mxu1 %v3256_v24 }
0x1a07   :  { %v2186_v13 = vpop.permute.xlu1 %2185 }
0x1a08   :  { %2788 = vmatmul.mubr.msk.f32.vlgmr.msra.gmra.mrb[16].mxu0 %vm1212_vm11, %v2186_v13  ;;  %vm2369_vm11 = vcmask 261120  }
0x1a09   :  { %2817 = vmatprep.mubr.msk.f32.mxu0 %vm3257_vm4, %v3252_v25  ;;  %v2275_v25 = vld [vmem:[%s4118_s18 + $0x38] sm:$0xff]  ;;  %2883 = vmatpush3.bf16.msra.mxu0 %v2882_v30  ;;  %vm2283_vm4 = vcmask 523264  }
0x1a0a   :  { %v2879_v23 = vpack.c.bf16 %v2275_v25, %v2274_v19  ;;  %2884 = vmatprep.subr.bf16.mxu0 %v3256_v24  ;;  %v2361_v24 = vld [vmem:[%s4120_s20 + $0x18] sm:$0xff] }
0x1a0b   :  { %v2885_v47 = vpack.c.bf16 %v2361_v24, %v2360_v28 }
0x1a0c   :  { %2880 = vmatpush3.bf16.msra.mxu1 %v2879_v23 }
0x1a0d   :  { %2886 = vmatpush3.bf16.msra.mxu0 %v2885_v47 }
0x1a6d   :  { %v2180_v31 = vpop.f32.mrb[18].mxu1 }
0x1a6e   :  { %v2782_v32 = vpop.f32.mrb[19].mxu1 }
0x1adb   :  { %v2255_v33 = vpop.f32.mrb[16].mxu0 }
0x1adc   :  { %v2256_v37 = vadd.f32 %v2255_v33, %v2180_v31  ;;  %v2789_v38 = vpop.f32.mrb[17].mxu0 }
0x1ade   :  { %v2266_v39 = vadd.f32 %v2576_v36, %v2256_v37 }
0x1ae0   :  { %v2267_v27 = vmax.f32 %v2266_v39, 0.0 }
0x1ae2   :  { %2807 = vmatmul.mubr.msk.f32.vlgmr.msra.gmra.mrb[20].mxu1 %vm2283_vm4, %v2267_v27 }
0x1bb5   :  { %v2353_v2 = vpop.f32.mrb[20].mxu1 }
0x1bb6   :  { %v2354_v48 = vadd.f32 %v2577_v3, %v2353_v2  ;;  %v2808_v49 = vpop.f32.mrb[21].mxu1 }
0x1bb8   :  { %v2357_v9 = vmax.f32 %v2354_v48, 0.0 }
0x1bba   :  { %2818 = vmatmul.mubr.msk.f32.vlgmr.msra.gmra.mrb[18].mxu0 %vm2369_vm11, %v2357_v9 }
0x1c8d   :  { %v2439_v43 = vpop.f32.mrb[18].mxu0 }
0x1c8e   :  { %v2440_v14 = vadd.f32 %v2579_v41, %v2439_v43  ;;  %v2819_v10 = vpop.f32.mrb[19].mxu0 }
0x1c90   :  { %v2581_v15 = vmul.f32 -1.442695, %v2440_v14 }
0x1c92   :  { %3063 = vpow2.f32 %v2581_v15 }
0x1c9c   :  { %v3064_v53 = vpop.eup %3063 }
0x1c9d   :  { %v2446_v35 = vadd.f32 1.0, %v3064_v53 }
0x1c9f   :  { %3065 = vrcp.f32 %v2446_v35 }
0x1ca9   :  { %v3066_v21 = vpop.eup %3065 }
0x1caa   :  { %2450 = vst.msk [vmem:[%s4121_s22] sm:$0xff] %vm2449_vm13, %v3066_v21 }
0x1cab   :  { %2455 = vsyncpa [#allocation8], 1 }
0x1cac   :  { %2456 = vsyncpa [#allocation10], 1 }
0x1cad   :  { %2457 = vsyncpa [#allocation13], 1 }
0x1cae   :  { %2458 = vsyncpa [#allocation16], 1 }

</bundles_post_ra>
